<compile_context>
chip_gen: v5e
topology: v5e:2x2
jax: 0.10.0
libtpu: 0.0.40
codegen_flags: <defaults>
</compile_context>

<pallas_src>
import jax
import jax.numpy as jnp
from jax.experimental import pallas as pl
from jax.experimental.pallas import tpu as pltpu


def _basic_block_kernel(
    x_ref,    # [TB, H]   input tile
    w1_ref,   # [H, H]    Linear1 weight with BN1 scale folded in  ([in, out] layout)
    b1_ref,   # [1, H]    Linear1 bias with BN1 fused (f32)
    w2_ref,   # [H, O]    Linear2 weight with BN2 scale folded in
    b2_ref,   # [1, O]    Linear2 bias with BN2 fused (f32)
    a_ref,    # [2]       PReLU alphas (SMEM)
    out_ref,  # [TB, O]
):
    # Scalar reads first (SMEM path) so they don't serialize behind MXU result pops.
    a1 = a_ref[0]
    a2 = a_ref[1]

    x = x_ref[...]

    # ---- Linear 1 (BN1 pre-folded) : MXU, f32 accumulator ----
    h = jnp.dot(x, w1_ref[...], preferred_element_type=jnp.float32) + b1_ref[...]
    # ---- PReLU 1 (cmp + mul + select = 3 VPU ops) ----
    h = jnp.where(h > 0, h, a1 * h)
    # ---- Dropout (eval) == identity ----
    # TODO(synk): training-mode stochastic dropout (pltpu.prng_random_bits) not emitted here.

    # ---- Linear 2 (BN2 pre-folded) : MXU, f32 accumulator ----
    h = jnp.dot(h.astype(w2_ref.dtype), w2_ref[...],
                preferred_element_type=jnp.float32) + b2_ref[...]
    # ---- PReLU 2 ----
    h = jnp.where(h > 0, h, a2 * h)
    # ---- Dropout (eval) == identity ----

    # ---- residual ----
    out_ref[...] = (h + x.astype(jnp.float32)).astype(out_ref.dtype)


def _vmem_budget_bytes():
    """Per-generation VMEM budget (v5e/v6e: 128 MiB, v7x: 64 MiB) with ~20% headroom."""
    try:
        cap = int(pltpu.get_tpu_info().vmem_capacity_bytes)
    except Exception:
        cap = 64 << 20  # conservative fallback (v7x per-TC)
    return int(cap * 0.8)


def basic_block(x, params, *, block_b=512):
    """x: [B, H]. params: dict from init_params (BN already folded into w/b)."""
    B, H = x.shape
    w1, b1, w2, b2, alphas = (params["w1"], params["b1"], params["w2"],
                              params["b2"], params["alphas"])
    O = w2.shape[1]
    assert O == H, "residual add requires output_dim == hidden_dim"

    # Batch tile: as large as block_b/B allow, multiple of the sublane pack (16 bf16 / 8 f32).
    sub = 16 if x.dtype == jnp.bfloat16 else 8
    tb = min(block_b, B)
    tb = max((tb // sub) * sub, min(B, sub))
    grid = (pl.cdiv(B, tb),)

    x_bytes = jnp.dtype(x.dtype).itemsize
    w_bytes = jnp.dtype(w1.dtype).itemsize
    budget = _vmem_budget_bytes()

    cost = pl.CostEstimate(
        flops=2 * B * H * H + 2 * B * H * O,
        transcendentals=0,
        bytes_accessed=(B * H + B * O) * x_bytes
        + (H * H + H * O) * w_bytes
        + (H + O) * 4,
    )

    def _call(single_buffer_weights):
        wbuf = 1 if single_buffer_weights else 2
        vmem_est = (
            (H * H + H * O) * w_bytes * wbuf      # resident weights
            + (H + O) * 4 * wbuf                  # resident biases (f32)
            + 2 * tb * H * x_bytes                # x tile, double-buffered
            + 2 * tb * O * x_bytes                # out tile, double-buffered
            + 3 * tb * max(H, O) * 4              # f32 intermediates / regalloc slack
        )
        vmem_limit = int(min(max(2 * vmem_est, 16 << 20), budget))

        res = dict(pipeline_mode=pl.Buffered(1)) if single_buffer_weights else {}
        in_specs = [
            pl.BlockSpec((tb, H), lambda i: (i, 0)),          # x: batch-tiled, pipelined
            pl.BlockSpec((H, H), lambda i: (0, 0), **res),    # w1: resident
            pl.BlockSpec((1, H), lambda i: (0, 0), **res),    # b1: resident
            pl.BlockSpec((H, O), lambda i: (0, 0), **res),    # w2: resident
            pl.BlockSpec((1, O), lambda i: (0, 0), **res),    # b2: resident
            pl.BlockSpec(memory_space=pltpu.SMEM),            # PReLU alphas (scalars)
        ]

        return pl.pallas_call(
            _basic_block_kernel,
            out_shape=jax.ShapeDtypeStruct((B, O), x.dtype),
            grid=grid,
            in_specs=in_specs,
            out_specs=pl.BlockSpec((tb, O), lambda i: (i, 0)),
            compiler_params=pltpu.CompilerParams(
                dimension_semantics=("parallel",),  # batch tiles shard across TCs (v7x megacore)
                vmem_limit_bytes=vmem_limit,
            ),
            cost_estimate=cost,
        )(x, w1, b1, w2, b2, alphas)

    try:
        return _call(True)
    except Exception:
        # pipeline_mode=pl.Buffered(1) not supported on this jax version -> fall back to
        # default double-buffered resident weights (costs 2x weight VMEM only).
        return _call(False)


def init_params(key, hidden_dim, output_dim, eps=1e-5, weight_dtype=jnp.bfloat16):
    """Synthetic parameters matching the PyTorch module; BN folded into Linear w/b."""
    ks = jax.random.split(key, 12)
    H, O = hidden_dim, output_dim

    # Linear weights stored [in, out] (transposed vs. PyTorch) so kernel does x @ W + b.
    w1 = jax.random.normal(ks[0], (H, H), jnp.float32) * 0.05
    b1 = jax.random.normal(ks[1], (1, H), jnp.float32) * 0.05
    w2 = jax.random.normal(ks[2], (H, O), jnp.float32) * 0.05
    b2 = jax.random.normal(ks[3], (1, O), jnp.float32) * 0.05

    # BatchNorm1d affine params + running stats (inference mode).
    g1 = 1.0 + 0.1 * jax.random.normal(ks[4], (1, H), jnp.float32)
    bt1 = 0.1 * jax.random.normal(ks[5], (1, H), jnp.float32)
    rm1 = 0.1 * jax.random.normal(ks[6], (1, H), jnp.float32)
    rv1 = 1.0 + 0.1 * jax.random.uniform(ks[7], (1, H), jnp.float32)

    g2 = 1.0 + 0.1 * jax.random.normal(ks[8], (1, O), jnp.float32)
    bt2 = 0.1 * jax.random.normal(ks[9], (1, O), jnp.float32)
    rm2 = 0.1 * jax.random.normal(ks[10], (1, O), jnp.float32)
    rv2 = 1.0 + 0.1 * jax.random.uniform(ks[11], (1, O), jnp.float32)

    s1 = g1 / jnp.sqrt(rv1 + eps)
    sh1 = bt1 - rm1 * s1
    s2 = g2 / jnp.sqrt(rv2 + eps)
    sh2 = bt2 - rm2 * s2

    # Fold BN (inference) into the Linear:  BN(x@w + b) = x@(w*s) + (b*s + sh)
    return dict(
        w1=(w1 * s1).astype(weight_dtype),
        b1=(b1 * s1 + sh1).astype(jnp.float32),
        w2=(w2 * s2).astype(weight_dtype),
        b2=(b2 * s2 + sh2).astype(jnp.float32),
        alphas=jnp.full((2,), 0.25, jnp.float32),   # PReLU default init
    )


def basic_block_ref(x, p):
    """Pure-JAX reference (same folded parameterization, mirrors the kernel's dtype casts)."""
    hp = jax.lax.Precision.HIGHEST
    xf = x.astype(jnp.float32)
    h = jnp.dot(xf, p["w1"].astype(jnp.float32), precision=hp) + p["b1"]
    h = jnp.where(h > 0, h, p["alphas"][0] * h)
    h = h.astype(p["w2"].dtype).astype(jnp.float32)   # mirror inter-layer downcast in kernel
    h = jnp.dot(h, p["w2"].astype(jnp.float32), precision=hp) + p["b2"]
    h = jnp.where(h > 0, h, p["alphas"][1] * h)
    return (h + xf).astype(x.dtype)


if __name__ == "__main__":
    # Lane/MXU-aligned shapes: hidden = 128, batch = 1024, batch tile = 256
    # -> 4 pipelined grid steps (keeps both v7x TensorCores busy). Production callers can
    # leave block_b at the default 512+.
    B, H = 1024, 128
    key = jax.random.PRNGKey(0)
    kx, kp = jax.random.split(key)

    x = jax.random.normal(kx, (B, H), jnp.float32).astype(jnp.bfloat16)
    params = init_params(kp, hidden_dim=H, output_dim=H, weight_dtype=jnp.bfloat16)

    out = jax.block_until_ready(basic_block(x, params, block_b=256))
    ref = basic_block_ref(x, params)

    assert out.shape == (B, H)
    err = float(jnp.max(jnp.abs(out.astype(jnp.float32) - ref.astype(jnp.float32))))
    assert jnp.allclose(out.astype(jnp.float32), ref.astype(jnp.float32),
                        atol=2e-2, rtol=2e-2), f"max abs err = {err}"

    print("KERNEL_OK")
</pallas_src>

<mosaic_0001>
module attributes {stable_mosaic.version = 11 : i64} {
  func.func @_basic_block_kernel(%arg0: i32, %arg1: memref<256x128xbf16, #tpu.memory_space<vmem>>, %arg2: memref<128x128xbf16, #tpu.memory_space<vmem>>, %arg3: memref<1x128xf32, #tpu.memory_space<vmem>>, %arg4: memref<128x128xbf16, #tpu.memory_space<vmem>>, %arg5: memref<1x128xf32, #tpu.memory_space<vmem>>, %arg6: memref<2xf32, #tpu.memory_space<smem>>, %arg7: memref<256x128xbf16, #tpu.memory_space<vmem>>) attributes {dimension_semantics = [#tpu.dimension_semantics<parallel>], iteration_bounds = array<i64: 4>, scalar_prefetch = 0 : i64, scratch_operands = 0 : i64, tpu.core_type = #tpu.core_type<tc>, window_params = [{transform_indices = @transform_0, window_bounds = array<i64: 256, 128>}, {pipeline_mode = #tpu.pipeline_mode<synchronous>, transform_indices = @transform_1, window_bounds = array<i64: 128, 128>}, {pipeline_mode = #tpu.pipeline_mode<synchronous>, transform_indices = @transform_2, window_bounds = array<i64: 1, 128>}, {pipeline_mode = #tpu.pipeline_mode<synchronous>, transform_indices = @transform_3, window_bounds = array<i64: 128, 128>}, {pipeline_mode = #tpu.pipeline_mode<synchronous>, transform_indices = @transform_4, window_bounds = array<i64: 1, 128>}, {transform_indices = @transform_5, window_bounds = array<i64: 2>}, {transform_indices = @transform_6, window_bounds = array<i64: 256, 128>}]} {
    %c0 = arith.constant 0 : index
    %0 = memref.load %arg6[%c0] : memref<2xf32, #tpu.memory_space<smem>>
    %c1 = arith.constant 1 : index
    %1 = memref.load %arg6[%c1] : memref<2xf32, #tpu.memory_space<smem>>
    %c0_0 = arith.constant 0 : index
    %c0_1 = arith.constant 0 : index
    %2 = vector.load %arg1[%c0_0, %c0_1] : memref<256x128xbf16, #tpu.memory_space<vmem>>, vector<256x128xbf16>
    %c0_2 = arith.constant 0 : index
    %c0_3 = arith.constant 0 : index
    %3 = vector.load %arg2[%c0_2, %c0_3] : memref<128x128xbf16, #tpu.memory_space<vmem>>, vector<128x128xbf16>
    %cst = arith.constant dense<0.000000e+00> : vector<256x128xf32>
    %4 = tpu.matmul %2, %3, %cst {dimension_numbers = #tpu.dot_dimension_numbers<[1], [0], [0], [1], [0, 0, 1, 1], [], []>} : vector<256x128xbf16>, vector<128x128xbf16>, vector<256x128xf32> -> vector<256x128xf32>
    %c0_4 = arith.constant 0 : index
    %c0_5 = arith.constant 0 : index
    %5 = vector.load %arg3[%c0_4, %c0_5] : memref<1x128xf32, #tpu.memory_space<vmem>>, vector<1x128xf32>
    %6 = vector.broadcast %5 : vector<1x128xf32> to vector<256x128xf32>
    %7 = arith.addf %4, %6 : vector<256x128xf32>
    %cst_6 = arith.constant 0.000000e+00 : f32
    %8 = vector.broadcast %cst_6 : f32 to vector<256x128xf32>
    %9 = arith.cmpf ogt, %7, %8 : vector<256x128xf32>
    %10 = vector.broadcast %0 : f32 to vector<256x128xf32>
    %11 = arith.mulf %10, %7 : vector<256x128xf32>
    %12 = arith.select %9, %7, %11 : vector<256x128xi1>, vector<256x128xf32>
    %13 = arith.truncf %12 : vector<256x128xf32> to vector<256x128xbf16>
    %c0_7 = arith.constant 0 : index
    %c0_8 = arith.constant 0 : index
    %14 = vector.load %arg4[%c0_7, %c0_8] : memref<128x128xbf16, #tpu.memory_space<vmem>>, vector<128x128xbf16>
    %cst_9 = arith.constant dense<0.000000e+00> : vector<256x128xf32>
    %15 = tpu.matmul %13, %14, %cst_9 {dimension_numbers = #tpu.dot_dimension_numbers<[1], [0], [0], [1], [0, 0, 1, 1], [], []>} : vector<256x128xbf16>, vector<128x128xbf16>, vector<256x128xf32> -> vector<256x128xf32>
    %c0_10 = arith.constant 0 : index
    %c0_11 = arith.constant 0 : index
    %16 = vector.load %arg5[%c0_10, %c0_11] : memref<1x128xf32, #tpu.memory_space<vmem>>, vector<1x128xf32>
    %17 = vector.broadcast %16 : vector<1x128xf32> to vector<256x128xf32>
    %18 = arith.addf %15, %17 : vector<256x128xf32>
    %cst_12 = arith.constant 0.000000e+00 : f32
    %19 = vector.broadcast %cst_12 : f32 to vector<256x128xf32>
    %20 = arith.cmpf ogt, %18, %19 : vector<256x128xf32>
    %21 = vector.broadcast %1 : f32 to vector<256x128xf32>
    %22 = arith.mulf %21, %18 : vector<256x128xf32>
    %23 = arith.select %20, %18, %22 : vector<256x128xi1>, vector<256x128xf32>
    %24 = arith.extf %2 : vector<256x128xbf16> to vector<256x128xf32>
    %25 = arith.addf %23, %24 : vector<256x128xf32>
    %26 = arith.truncf %25 : vector<256x128xf32> to vector<256x128xbf16>
    %c0_13 = arith.constant 0 : index
    %c0_14 = arith.constant 0 : index
    %27 = vector.load %arg7[%c0_13, %c0_14] : memref<256x128xbf16, #tpu.memory_space<vmem>>, vector<256x128xbf16>
    tpu.vector_store %arg7[%c0_13, %c0_14], %26 {strides = array<i32>} : memref<256x128xbf16, #tpu.memory_space<vmem>>, vector<256x128xbf16>,
    return
  }
  func.func @transform_0(%arg0: i32) -> (i32, i32) {
    %c0_i32 = arith.constant 0 : i32
    %c0_i32_0 = arith.constant 0 : i32
    return %arg0, %c0_i32 : i32, i32
  }
  func.func @transform_1(%arg0: i32) -> (i32, i32) {
    %c0_i32 = arith.constant 0 : i32
    %c0_i32_0 = arith.constant 0 : i32
    %c0_i32_1 = arith.constant 0 : i32
    return %c0_i32, %c0_i32_0 : i32, i32
  }
  func.func @transform_2(%arg0: i32) -> (i32, i32) {
    %c0_i32 = arith.constant 0 : i32
    %c0_i32_0 = arith.constant 0 : i32
    %c0_i32_1 = arith.constant 0 : i32
    return %c0_i32, %c0_i32_0 : i32, i32
  }
  func.func @transform_3(%arg0: i32) -> (i32, i32) {
    %c0_i32 = arith.constant 0 : i32
    %c0_i32_0 = arith.constant 0 : i32
    %c0_i32_1 = arith.constant 0 : i32
    return %c0_i32, %c0_i32_0 : i32, i32
  }
  func.func @transform_4(%arg0: i32) -> (i32, i32) {
    %c0_i32 = arith.constant 0 : i32
    %c0_i32_0 = arith.constant 0 : i32
    %c0_i32_1 = arith.constant 0 : i32
    return %c0_i32, %c0_i32_0 : i32, i32
  }
  func.func @transform_5(%arg0: i32) -> i32 {
    %c0_i32 = arith.constant 0 : i32
    %c0_i32_0 = arith.constant 0 : i32
    return %c0_i32 : i32
  }
  func.func @transform_6(%arg0: i32) -> (i32, i32) {
    %c0_i32 = arith.constant 0 : i32
    %c0_i32_0 = arith.constant 0 : i32
    return %arg0, %c0_i32 : i32, i32
  }
}

module attributes {stable_mosaic.version = 11 : i64} {
  func.func @_basic_block_kernel(%arg0: i32, %arg1: memref<256x128xbf16, #tpu.memory_space<vmem>>, %arg2: memref<128x128xbf16, #tpu.memory_space<vmem>>, %arg3: memref<1x128xf32, #tpu.memory_space<vmem>>, %arg4: memref<128x128xbf16, #tpu.memory_space<vmem>>, %arg5: memref<1x128xf32, #tpu.memory_space<vmem>>, %arg6: memref<2xf32, #tpu.memory_space<smem>>, %arg7: memref<256x128xbf16, #tpu.memory_space<vmem>>) attributes {dimension_semantics = [#tpu.dimension_semantics<parallel>], iteration_bounds = array<i64: 4>, scalar_prefetch = 0 : i64, scratch_operands = 0 : i64, tpu.core_type = #tpu.core_type<tc>, window_params = [{transform_indices = @transform_0, window_bounds = array<i64: 256, 128>}, {pipeline_mode = #tpu.pipeline_mode<synchronous>, transform_indices = @transform_1, window_bounds = array<i64: 128, 128>}, {pipeline_mode = #tpu.pipeline_mode<synchronous>, transform_indices = @transform_2, window_bounds = array<i64: 1, 128>}, {pipeline_mode = #tpu.pipeline_mode<synchronous>, transform_indices = @transform_3, window_bounds = array<i64: 128, 128>}, {pipeline_mode = #tpu.pipeline_mode<synchronous>, transform_indices = @transform_4, window_bounds = array<i64: 1, 128>}, {transform_indices = @transform_5, window_bounds = array<i64: 2>}, {transform_indices = @transform_6, window_bounds = array<i64: 256, 128>}]} {
    %c0 = arith.constant 0 : index
    %0 = memref.load %arg6[%c0] : memref<2xf32, #tpu.memory_space<smem>>
    %c1 = arith.constant 1 : index
    %1 = memref.load %arg6[%c1] : memref<2xf32, #tpu.memory_space<smem>>
    %c0_0 = arith.constant 0 : index
    %c0_1 = arith.constant 0 : index
    %2 = vector.load %arg1[%c0_0, %c0_1] : memref<256x128xbf16, #tpu.memory_space<vmem>>, vector<256x128xbf16>
    %c0_2 = arith.constant 0 : index
    %c0_3 = arith.constant 0 : index
    %3 = vector.load %arg2[%c0_2, %c0_3] : memref<128x128xbf16, #tpu.memory_space<vmem>>, vector<128x128xbf16>
    %cst = arith.constant dense<0.000000e+00> : vector<256x128xf32>
    %4 = tpu.matmul %2, %3, %cst {dimension_numbers = #tpu.dot_dimension_numbers<[1], [0], [0], [1], [0, 0, 1, 1], [], []>} : vector<256x128xbf16>, vector<128x128xbf16>, vector<256x128xf32> -> vector<256x128xf32>
    %c0_4 = arith.constant 0 : index
    %c0_5 = arith.constant 0 : index
    %5 = vector.load %arg3[%c0_4, %c0_5] : memref<1x128xf32, #tpu.memory_space<vmem>>, vector<1x128xf32>
    %6 = vector.broadcast %5 : vector<1x128xf32> to vector<256x128xf32>
    %7 = arith.addf %4, %6 : vector<256x128xf32>
    %cst_6 = arith.constant 0.000000e+00 : f32
    %8 = vector.broadcast %cst_6 : f32 to vector<256x128xf32>
    %9 = arith.cmpf ogt, %7, %8 : vector<256x128xf32>
    %10 = vector.broadcast %0 : f32 to vector<256x128xf32>
    %11 = arith.mulf %10, %7 : vector<256x128xf32>
    %12 = arith.select %9, %7, %11 : vector<256x128xi1>, vector<256x128xf32>
    %13 = arith.truncf %12 : vector<256x128xf32> to vector<256x128xbf16>
    %c0_7 = arith.constant 0 : index
    %c0_8 = arith.constant 0 : index
    %14 = vector.load %arg4[%c0_7, %c0_8] : memref<128x128xbf16, #tpu.memory_space<vmem>>, vector<128x128xbf16>
    %cst_9 = arith.constant dense<0.000000e+00> : vector<256x128xf32>
    %15 = tpu.matmul %13, %14, %cst_9 {dimension_numbers = #tpu.dot_dimension_numbers<[1], [0], [0], [1], [0, 0, 1, 1], [], []>} : vector<256x128xbf16>, vector<128x128xbf16>, vector<256x128xf32> -> vector<256x128xf32>
    %c0_10 = arith.constant 0 : index
    %c0_11 = arith.constant 0 : index
    %16 = vector.load %arg5[%c0_10, %c0_11] : memref<1x128xf32, #tpu.memory_space<vmem>>, vector<1x128xf32>
    %17 = vector.broadcast %16 : vector<1x128xf32> to vector<256x128xf32>
    %18 = arith.addf %15, %17 : vector<256x128xf32>
    %cst_12 = arith.constant 0.000000e+00 : f32
    %19 = vector.broadcast %cst_12 : f32 to vector<256x128xf32>
    %20 = arith.cmpf ogt, %18, %19 : vector<256x128xf32>
    %21 = vector.broadcast %1 : f32 to vector<256x128xf32>
    %22 = arith.mulf %21, %18 : vector<256x128xf32>
    %23 = arith.select %20, %18, %22 : vector<256x128xi1>, vector<256x128xf32>
    %24 = arith.extf %2 : vector<256x128xbf16> to vector<256x128xf32>
    %25 = arith.addf %23, %24 : vector<256x128xf32>
    %26 = arith.truncf %25 : vector<256x128xf32> to vector<256x128xbf16>
    %c0_13 = arith.constant 0 : index
    %c0_14 = arith.constant 0 : index
    %27 = vector.load %arg7[%c0_13, %c0_14] : memref<256x128xbf16, #tpu.memory_space<vmem>>, vector<256x128xbf16>
    tpu.vector_store %arg7[%c0_13, %c0_14], %26 {strides = array<i32>} : memref<256x128xbf16, #tpu.memory_space<vmem>>, vector<256x128xbf16>,
    return
  }
  func.func @transform_0(%arg0: i32) -> (i32, i32) {
    %c0_i32 = arith.constant 0 : i32
    %c0_i32_0 = arith.constant 0 : i32
    return %arg0, %c0_i32 : i32, i32
  }
  func.func @transform_1(%arg0: i32) -> (i32, i32) {
    %c0_i32 = arith.constant 0 : i32
    %c0_i32_0 = arith.constant 0 : i32
    %c0_i32_1 = arith.constant 0 : i32
    return %c0_i32, %c0_i32_0 : i32, i32
  }
  func.func @transform_2(%arg0: i32) -> (i32, i32) {
    %c0_i32 = arith.constant 0 : i32
    %c0_i32_0 = arith.constant 0 : i32
    %c0_i32_1 = arith.constant 0 : i32
    return %c0_i32, %c0_i32_0 : i32, i32
  }
  func.func @transform_3(%arg0: i32) -> (i32, i32) {
    %c0_i32 = arith.constant 0 : i32
    %c0_i32_0 = arith.constant 0 : i32
    %c0_i32_1 = arith.constant 0 : i32
    return %c0_i32, %c0_i32_0 : i32, i32
  }
  func.func @transform_4(%arg0: i32) -> (i32, i32) {
    %c0_i32 = arith.constant 0 : i32
    %c0_i32_0 = arith.constant 0 : i32
    %c0_i32_1 = arith.constant 0 : i32
    return %c0_i32, %c0_i32_0 : i32, i32
  }
  func.func @transform_5(%arg0: i32) -> i32 {
    %c0_i32 = arith.constant 0 : i32
    %c0_i32_0 = arith.constant 0 : i32
    return %c0_i32 : i32
  }
  func.func @transform_6(%arg0: i32) -> (i32, i32) {
    %c0_i32 = arith.constant 0 : i32
    %c0_i32_0 = arith.constant 0 : i32
    return %arg0, %c0_i32 : i32, i32
  }
}

</mosaic_0001>

<bundles_post_ra>
// kernel: tpu_custom_call.1
= control target key start
LH: loop header
LB: loop body
LE: loop exit
PB: predicated region body
PF: predicated region fallthrough
CT: control target
= control target key end

     0   :  { %11 = vsyncpa [#allocation3], 0  ;;  %s2177_s0 = inlined_call_operand.hbm [shape: bf16[1024,128], index: 0, kind: input, shape index: {}]   ;;  %s2178_s1 = inlined_call_operand.hbm [shape: bf16[128,128], index: 1, kind: input, shape index: {}]   ;;  %s2179_s2 = inlined_call_operand.vmem [shape: f32[1,128], index: 2, kind: input, shape index: {}]   ;;  %s2180_s3 = inlined_call_operand.hbm [shape: bf16[128,128], index: 3, kind: input, shape index: {}]   ;;  %s2181_s4 = inlined_call_operand.vmem [shape: f32[1,128], index: 4, kind: input, shape index: {}]   ;;  %s2182_s5 = inlined_call_operand.vmem [shape: f32[2], index: 5, kind: input, shape index: {}]   ;;  %s2183_s6 = inlined_call_operand.hbm [shape: bf16[1024,128], index: 6, kind: output, shape index: {}]  }
   0x1   :  { %13 = vsyncpa [#allocation3 + $0x1], 0 }
   0x2   :  { %14 = vsyncpa [#allocation7], 0 }
   0x3   :  { %15 = vsyncpa [#allocation5], 0 }
   0x4   :  { %16 = vsyncpa [#allocation4], 0 }
   0x5   :  { %18 = vsyncpa [#allocation4 + $0x1], 0  ;;  %s1823_s21 = smov 0   ;;  %s1825_s22 = smov 0  }
   0x6   :  { %s1827_s23 = smov 0   ;;  %s1829_s24 = smov 0  }
   0x7 LB: > { %s1844_s25 = sadd.s32 4294967295, %s1779_s24   ;;  %s1223_s26 = sadd.s32 4294967294, %s1779_s24   ;;  %s1779_s24 = sphi %s1829_s24, %s2196_s24   ;;  %s1775_s23 = sphi %s1827_s23, %s2195_s23   ;;  %s1771_s22 = sphi %s1825_s22, %s2194_s22   ;;  %s1767_s21 = sphi %s1823_s21, %s2193_s21  }
   0x8   : > { %p44_p0 = scmp.ne.s32.totalorder %s1771_s22, %s1767_s21  ;;  %p45_p1 = scmp.eq.s32.totalorder %s1844_s25, 0 }
   0x9   : > { %p173_p2 = scmp.eq.s32.totalorder %s1844_s25, 3  ;;  %p179_p3 = scmp.eq.s32.totalorder %s1223_s26, 3 }
   0xa   : > { %p1853_p4 = por %p45_p1, %p44_p0  ;;  %p1224_p5 = scmp.ge.s32.totalorder %s1779_s24, 1 }
   0xb   : > { %p1858_p6 = por %p179_p3, %p44_p0  ;;  %p186_p7 = scmp.lt.s32.totalorder %s1779_s24, 5 }
   0xc   : > { %s197_s7 = sshll.u32 %s2178_s1, 4  ;;  %s1781_s9 = smov [#allocation6]   ;;  %s198_s7 = int_to_ptr.hbm [resolvable:$true] %s197_s7 }
   0xd   : > { %p1866_p8 = pnand %p1224_p5, %p186_p7  ;;  %s199_s10 = sshll.u32 %s1781_s9, 4  ;;  %s200_s10 = int_to_ptr.vmem [resolvable:$true] %s199_s10 }
   0xe   : > { %s214_s13 = sshll.u32 %s2180_s3, 4  ;;  %s2184_s14 = smov 64   ;;  %s215_s13 = int_to_ptr.hbm [resolvable:$true] %s214_s13 }
   0xf   : > { %p1533_p9 = pneg %p1866_p8  ;;  %s2185_s15 = smov 4  }
  0x10   : > { %s1784_s16 = smov [#allocation8]   ;;  %s232_s20 = sshll.u32 %s2182_s5, 4  ;;  %s233_s20 = int_to_ptr.vmem [resolvable:$true] %s232_s20 }
  0x11   : > { %p1534_p10 = pnand %p1533_p9, %p45_p1  ;;  %s216_s17 = sshll.u32 %s1784_s16, 4  ;;  %s217_s17 = int_to_ptr.vmem [resolvable:$true] %s216_s17 }
  0x12   : > { %s1785_s26 = smov [#allocation9]   ;;  %s1887_s29 = sadd.s32 1, %s1779_s24  }
  0x13   : > { %1536 = dma.hbm_to_vmem [thread:$0]  (!%p1534_p10), %s198_s7, 1024, %s200_s10, [#allocation7], %s2184_s14, %s2184_s14, %s2185_s15  }
  0x14   : > { %1539 = dma.hbm_to_vmem [thread:$0]  (!%p1534_p10), %s215_s13, 1024, %s217_s17, [#allocation7], %s2184_s14, %s2184_s14, %s2185_s15  }
  0x15   : > { %1542 = dma.vmem_to_smem (!%p1534_p10), %s233_s20, 16, %s1785_s26, [#allocation5]  }
  0x16   : > { %s28_s30 = ssub.s32 %s1779_s24, %s1887_s29  ;;  %s31_s7 = sadd.s32 1, %s1775_s23 }
  0x17   : > { %p29_p11 = scmp.eq.s32.totalorder %s28_s30, 0  ;;  %p38_p12 = scmp.ne.s32.totalorder %s1775_s23, %s1771_s22 }
  0x18   : > { %p39_p13 = scmp.eq.s32.totalorder %s1779_s24, 0  ;;  %p1554_p3 = scmp.lt.s32.totalorder %s1779_s24, 4 }
  0x19   : > { %s1896_s9 = scalar_select %p29_p11, %s1775_s23, %s31_s7  }
  0x1a   : > { %p1900_p0 = por %p173_p2, %p38_p12  ;;  %s243_s11 = sand.u32 1, %s1775_s23  }
  0x1b   : > { %s1372_s12 = sshll.u32 %s1779_s24, 7  ;;  %p40_p5 = por %p39_p13, %p38_p12 }
  0x1c   : > { %s1229_s13 = sshll.u32 %s243_s11, 7  ;;  %s252_s18 = scalar_lea.hbm %s2177_s0, %s1372_s12 }
  0x1d   : > { %s253_s19 = sshll.u32 %s252_s18, 4  ;;  %s247_s20 = scalar_lea.vmem [#allocation2], %s1229_s13  ;;  %s254_s19 = int_to_ptr.hbm [resolvable:$true] %s253_s19 }
  0x1e   : > { %s255_s26 = sshll.u32 %s247_s20, 4  ;;  %p1910_p7 = pnand %p1554_p3, %p40_p5  ;;  %s256_s26 = int_to_ptr.vmem [resolvable:$true] %s255_s26 }
  0x1f   : > { %s244_s7 = scalar_lea.sflag [#allocation3], %s243_s11  ;;  %s1675_s14 = sshra.s32 %s254_s19, 4  ;;  %s1676_s14 = int_to_ptr.hbm [resolvable:$true] %s1675_s14 }
  0x20   : > { %s1677_s15 = scalar_lea.hbm %s1676_s14, 128  ;;  %p1679_p9 = pneg %p1910_p7 }
  0x21   : > { %p1678_p2 = scmp.ne.s32.totalorder %s1676_s14, %s1677_s15  ;;  %s1682_s13 = scalar_lea.hbm %s2177_s0, 512 }
  0x22   : > { %p1683_p12 = scmp.lt.s32.totalorder %s1676_s14, %s2177_s0  ;;  %p1684_p13 = scmp.lt.s32.totalorder %s1682_s13, %s1677_s15 }
  0x23   : > { %p1680_p10 = pnand %p1679_p9, %p1678_p2 }
  0x24   : > { %p1685_p3 = por %p1684_p13, %p1683_p12 }
  0x25   : > { %p1681_p11 = pneg %p1680_p10 }
  0x27   : > { %p1686_p5 = pnand %p1685_p3, %p1681_p11 }
  0x29   : > { %1689 = shalt.err (!%p1686_p5)
}
  0x2a   : > { %s2191_s11 = smov 4   ;;  %s2192_s20 = smov 64  }
  0x2b   : > { %1546 = dma.hbm_to_vmem [thread:$0]  (!%p1910_p7), %s254_s19, 2048, %s256_s26, %s244_s7, %s2192_s20, %s2192_s20, %s2191_s11  }
  0x2c   : > { %267 = sbr.rel (%p1866_p8) target bundleno = 500 (0x1f4), region = 44  ;;  %s1930_s12 = sand.u32 (!%p1866_p8), 1, %s1771_s22  }
  0x2d   : > { %s1233_s14 = sshll.u32 (!%p1866_p8), %s1930_s12, 7  ;;  %s270_s15 = scalar_lea.sflag (!%p1866_p8), [#allocation3], %s1930_s12 }
  0x2e   : > { %s1936_s16 = scalar_lea.vmem (!%p1866_p8), [#allocation2], %s1233_s14 }
  0x31   : > { %1750 = dma.done.wait (%p1853_p4), %s270_s15, 2048  }
  0x32   : > { %1752 = vsyncadd (%p1853_p4), %s270_s15, 4294965248 }
  0x33   : > { %1754 = dma.done.wait (%p45_p1), [#allocation7], 2048  }
  0x34   : > { %1756 = vsyncadd (%p45_p1), [#allocation7], 4294965248 }
  0x35   : > { %1758 = dma.done.wait (%p45_p1), [#allocation5], 16  }
  0x36   : > { %1760 = vsyncadd (%p45_p1), [#allocation5], 4294967280 }
  0x37   : > { %294 = sfence }
  0x38   : > { %v1396_v0 = vld [vmem:[#allocation6 + $0x38] sm:$0xff]  ;;  %v1395_v1 = vld [vmem:[#allocation6 + $0x30] sm:$0xff]  ;;  %v1394_v2 = vld [vmem:[#allocation6 + $0x28] sm:$0xff]  ;;  %s321_s27 = sld [smem:[#allocation9]]  ;;  %s2052_s13 = scalar_lea.vmem [#allocation10], %s1233_s14 }
  0x39   : > { %519 = vmatpush.bf16.msra.mxu0 %v1396_v0  ;;  %1501 = vmatpush.bf16.msra.mxu2 %v1396_v0  ;;  %v1393_v3 = vld [vmem:[#allocation6 + $0x20] sm:$0xff]  ;;  %v1392_v4 = vld [vmem:[#allocation6 + $0x18] sm:$0xff]  ;;  %v1391_v5 = vld [vmem:[#allocation6 + $0x10] sm:$0xff]  ;;  %s1238_s26 = sld [smem:[#allocation9 + $0x1]]  ;;  %s1405_s17 = sshll.u32 %s1844_s25, 7 }
  0x3a   : > { %v1390_v6 = vld [vmem:[#allocation6 + $0x8] sm:$0xff]  ;;  %v1389_v7 = vld [vmem:[#allocation6] sm:$0xff]  ;;  %v1375_v12 = vld [vmem:[%s1936_s16 + $0x10] sm:$0xff]  ;;  %s1115_s20 = scalar_lea.hbm %s2183_s6, %s1405_s17  ;;  %s1116_s25 = sshll.u32 %s2052_s13, 4  ;;  %s1117_s25 = int_to_ptr.vmem [resolvable:$true] %s1116_s25 }
  0x3b   : > { %v1373_v8 = vld [vmem:[%s1936_s16] sm:$0xff]  ;;  %v1374_v10 = vld [vmem:[%s1936_s16 + $0x8] sm:$0xff]  ;;  %v1383_v13 = vld [vmem:[%s1936_s16 + $0x50] sm:$0xff]  ;;  %s1118_s14 = sshll.u32 %s1115_s20, 4  ;;  %s1104_s15 = scalar_lea.sflag [#allocation4], %s1930_s12  ;;  %s1119_s14 = int_to_ptr.hbm [resolvable:$true] %s1118_s14 }
  0x3c   : > { %v1381_v9 = vld [vmem:[%s1936_s16 + $0x40] sm:$0xff]  ;;  %v1382_v11 = vld [vmem:[%s1936_s16 + $0x48] sm:$0xff]  ;;  %v1376_v14 = vld [vmem:[%s1936_s16 + $0x18] sm:$0xff] }
  0x3d   : > { %520 = vmatpush.bf16.msra.mxu0 %v1395_v1  ;;  %1502 = vmatpush.bf16.msra.mxu2 %v1395_v1  ;;  %v1384_v15 = vld [vmem:[%s1936_s16 + $0x58] sm:$0xff]  ;;  %v1377_v16 = vld [vmem:[%s1936_s16 + $0x20] sm:$0xff]  ;;  %v1378_v19 = vld [vmem:[%s1936_s16 + $0x28] sm:$0xff] }
  0x3e   : > { %v1385_v17 = vld [vmem:[%s1936_s16 + $0x60] sm:$0xff]  ;;  %v1404_v18 = vld [vmem:[#allocation8 + $0x38] sm:$0xff]  ;;  %v1386_v20 = vld [vmem:[%s1936_s16 + $0x68] sm:$0xff]  ;;  %v1972_v35 = vstv %s321_s27 }
  0x3f   : > { %789 = vmatpush.bf16.msra.mxu1 %v1404_v18  ;;  %1509 = vmatpush.bf16.msra.mxu3 %v1404_v18  ;;  %v1403_v21 = vld [vmem:[#allocation8 + $0x30] sm:$0xff]  ;;  %v1402_v22 = vld [vmem:[#allocation8 + $0x28] sm:$0xff]  ;;  %v1401_v23 = vld [vmem:[#allocation8 + $0x20] sm:$0xff] }
  0x40   : > { %v1379_v24 = vld [vmem:[%s1936_s16 + $0x30] sm:$0xff]  ;;  %v1400_v26 = vld [vmem:[#allocation8 + $0x18] sm:$0xff]  ;;  %v1398_v28 = vld [vmem:[#allocation8 + $0x8] sm:$0xff] }
  0x41   : > { %521 = vmatpush.bf16.msra.mxu0 %v1394_v2  ;;  %1503 = vmatpush.bf16.msra.mxu2 %v1394_v2  ;;  %v1387_v25 = vld [vmem:[%s1936_s16 + $0x70] sm:$0xff]  ;;  %v1397_v29 = vld [vmem:[#allocation8] sm:$0xff]  ;;  %v1380_v30 = vld [vmem:[%s1936_s16 + $0x38] sm:$0xff] }
  0x42   : > { %v1399_v27 = vld [vmem:[#allocation8 + $0x10] sm:$0xff]  ;;  %v1388_v31 = vld [vmem:[%s1936_s16 + $0x78] sm:$0xff]  ;;  %v1969_v33 = vld [vmem:[%s2179_s2] ss:$0 sm:$0xff] }
  0x43   : > { %790 = vmatpush.bf16.msra.mxu1 %v1403_v21  ;;  %1510 = vmatpush.bf16.msra.mxu3 %v1403_v21 }
  0x45   : > { %522 = vmatpush.bf16.msra.mxu0 %v1393_v3  ;;  %1504 = vmatpush.bf16.msra.mxu2 %v1393_v3 }
  0x47   : > { %791 = vmatpush.bf16.msra.mxu1 %v1402_v22  ;;  %1511 = vmatpush.bf16.msra.mxu3 %v1402_v22 }
  0x49   : > { %523 = vmatpush.bf16.msra.mxu0 %v1392_v4  ;;  %1505 = vmatpush.bf16.msra.mxu2 %v1392_v4 }
  0x4b   : > { %792 = vmatpush.bf16.msra.mxu1 %v1401_v23  ;;  %1512 = vmatpush.bf16.msra.mxu3 %v1401_v23 }
  0x4d   : > { %524 = vmatpush.bf16.msra.mxu0 %v1391_v5  ;;  %1506 = vmatpush.bf16.msra.mxu2 %v1391_v5 }
  0x4f   : > { %793 = vmatpush.bf16.msra.mxu1 %v1400_v26  ;;  %1513 = vmatpush.bf16.msra.mxu3 %v1400_v26 }
  0x51   : > { %525 = vmatpush.bf16.msra.mxu0 %v1390_v6  ;;  %1507 = vmatpush.bf16.msra.mxu2 %v1390_v6 }
  0x53   : > { %794 = vmatpush.bf16.msra.mxu1 %v1399_v27  ;;  %1514 = vmatpush.bf16.msra.mxu3 %v1399_v27 }
  0x55   : > { %526 = vmatpush.bf16.msra.mxu0 %v1389_v7  ;;  %1508 = vmatpush.bf16.msra.mxu2 %v1389_v7 }
  0x57   : > { %795 = vmatpush.bf16.msra.mxu1 %v1398_v28  ;;  %1515 = vmatpush.bf16.msra.mxu3 %v1398_v28 }
  0x58   : > { %527 = vmatmul.bf16.vlgmr.msra.gmra.mxu0 %v1373_v8  ;;  %567 = vmatmul.bf16.vlgmr.msra.gmra.mxu2 %v1381_v9 }
  0x5b   : > { %796 = vmatpush.bf16.msra.mxu1 %v1397_v29  ;;  %1516 = vmatpush.bf16.msra.mxu3 %v1397_v29 }
  0x68   : > { %532 = vmatmul.bf16.gmra.mxu0 %v1374_v10  ;;  %572 = vmatmul.bf16.gmra.mxu2 %v1382_v11 }
  0x78   : > { %537 = vmatmul.bf16.gmra.mxu0 %v1375_v12  ;;  %577 = vmatmul.bf16.gmra.mxu2 %v1383_v13 }
  0x88   : > { %542 = vmatmul.bf16.gmra.mxu0 %v1376_v14  ;;  %582 = vmatmul.bf16.gmra.mxu2 %v1384_v15 }
  0x98   : > { %547 = vmatmul.bf16.gmra.mxu0 %v1377_v16  ;;  %587 = vmatmul.bf16.gmra.mxu2 %v1385_v17 }
  0xa8   : > { %552 = vmatmul.bf16.gmra.mxu0 %v1378_v19  ;;  %592 = vmatmul.bf16.gmra.mxu2 %v1386_v20 }
  0xb8   : > { %557 = vmatmul.bf16.gmra.mxu0 %v1379_v24  ;;  %597 = vmatmul.bf16.gmra.mxu2 %v1387_v25 }
  0xc8   : > { %562 = vmatmul.bf16.gmra.mxu0 %v1380_v30  ;;  %602 = vmatmul.bf16.gmra.mxu2 %v1388_v31 }
  0xd5   : > { %v528_v32 = vpop.f32.mrf.mxu0 }
  0xd6   : > { %v529_v34 = vadd.f32 %v1969_v33, %v528_v32 }
  0xd8   : > { %v641_v37 = vmul.f32 %v1972_v35, %v529_v34  ;;  %vm608_vm0 = vcmp.gt.f32.partialorder %v529_v34, 0.0 }
  0xda   : > { %v673_v42 = vsel %vm608_vm0, %v529_v34, %v641_v37 }
  0xdb   : > { %v568_v36 = vpop.f32.mrf.mxu2 }
  0xdc   : > { %v569_v40 = vadd.f32 %v1969_v33, %v568_v36 }
  0xdd   : > { %v530_v38 = vpop.f32.mrf.mxu0 }
  0xde   : > { %v531_v39 = vadd.f32 %v1969_v33, %v530_v38  ;;  %v657_v46 = vmul.f32 %v1972_v35, %v569_v40  ;;  %vm624_vm2 = vcmp.gt.f32.partialorder %v569_v40, 0.0 }
  0xe0   : > { %v642_v41 = vmul.f32 %v1972_v35, %v531_v39  ;;  %vm609_vm1 = vcmp.gt.f32.partialorder %v531_v39, 0.0  ;;  %v689_v51 = vsel %vm624_vm2, %v569_v40, %v657_v46 }
  0xe2   : > { %v674_v43 = vsel %vm609_vm1, %v531_v39, %v642_v41 }
  0xe3   : > { %v570_v44 = vpop.f32.mrf.mxu2  ;;  %v705_v45 = vpack.c.bf16 %v674_v43, %v673_v42 }
  0xe4   : > { %v571_v47 = vadd.f32 %v1969_v33, %v570_v44 }
  0xe5   : > { %v533_v48 = vpop.f32.mrf.mxu0  ;;  %797 = vmatmul.bf16.vlgmr.msra.gmra.mxu1 %v705_v45 }
  0xe6   : > { %v658_v49 = vmul.f32 %v1972_v35, %v571_v47  ;;  %vm625_vm3 = vcmp.gt.f32.partialorder %v571_v47, 0.0  ;;  %v534_v50 = vadd.f32 %v1969_v33, %v533_v48 }
  0xe8   : > { %v690_v52 = vsel %vm625_vm3, %v571_v47, %v658_v49  ;;  %v643_v55 = vmul.f32 %v1972_v35, %v534_v50  ;;  %vm610_vm4 = vcmp.gt.f32.partialorder %v534_v50, 0.0 }
  0xe9   : > { %v713_v53 = vpack.c.bf16 %v690_v52, %v689_v51 }
  0xea   : > { %v675_v60 = vsel %vm610_vm4, %v534_v50, %v643_v55 }
  0xeb   : > { %v573_v54 = vpop.f32.mrf.mxu2  ;;  %837 = vmatmul.bf16.vlgmr.msra.gmra.mxu3 %v713_v53 }
  0xec   : > { %v574_v58 = vadd.f32 %v1969_v33, %v573_v54 }
  0xed   : > { %v535_v56 = vpop.f32.mrf.mxu0 }
  0xee   : > { %v536_v57 = vadd.f32 %v1969_v33, %v535_v56  ;;  %v659_v0 = vmul.f32 %v1972_v35, %v574_v58  ;;  %vm626_vm6 = vcmp.gt.f32.partialorder %v574_v58, 0.0 }
  0xf0   : > { %v644_v59 = vmul.f32 %v1972_v35, %v536_v57  ;;  %vm611_vm5 = vcmp.gt.f32.partialorder %v536_v57, 0.0  ;;  %v691_v5 = vsel %vm626_vm6, %v574_v58, %v659_v0 }
  0xf2   : > { %v676_v61 = vsel %vm611_vm5, %v536_v57, %v644_v59 }
  0xf3   : > { %v575_v62 = vpop.f32.mrf.mxu2  ;;  %v706_v63 = vpack.c.bf16 %v676_v61, %v675_v60 }
  0xf4   : > { %v576_v1 = vadd.f32 %v1969_v33, %v575_v62 }
  0xf5   : > { %v538_v2 = vpop.f32.mrf.mxu0  ;;  %802 = vmatmul.bf16.gmra.mxu1 %v706_v63 }
  0xf6   : > { %v660_v3 = vmul.f32 %v1972_v35, %v576_v1  ;;  %vm627_vm7 = vcmp.gt.f32.partialorder %v576_v1, 0.0  ;;  %v539_v4 = vadd.f32 %v1969_v33, %v538_v2 }
  0xf8   : > { %v692_v6 = vsel %vm627_vm7, %v576_v1, %v660_v3  ;;  %v645_v9 = vmul.f32 %v1972_v35, %v539_v4  ;;  %vm612_vm8 = vcmp.gt.f32.partialorder %v539_v4, 0.0 }
  0xf9   : > { %v714_v7 = vpack.c.bf16 %v692_v6, %v691_v5 }
  0xfa   : > { %v677_v14 = vsel %vm612_vm8, %v539_v4, %v645_v9 }
  0xfb   : > { %v578_v8 = vpop.f32.mrf.mxu2  ;;  %842 = vmatmul.bf16.gmra.mxu3 %v714_v7 }
  0xfc   : > { %v579_v12 = vadd.f32 %v1969_v33, %v578_v8 }
  0xfd   : > { %v540_v10 = vpop.f32.mrf.mxu0 }
  0xfe   : > { %v541_v11 = vadd.f32 %v1969_v33, %v540_v10  ;;  %v661_v18 = vmul.f32 %v1972_v35, %v579_v12  ;;  %vm628_vm10 = vcmp.gt.f32.partialorder %v579_v12, 0.0 }
 0x100   : > { %v646_v13 = vmul.f32 %v1972_v35, %v541_v11  ;;  %vm613_vm9 = vcmp.gt.f32.partialorder %v541_v11, 0.0  ;;  %v693_v23 = vsel %vm628_vm10, %v579_v12, %v661_v18 }
 0x102   : > { %v678_v15 = vsel %vm613_vm9, %v541_v11, %v646_v13 }
 0x103   : > { %v580_v16 = vpop.f32.mrf.mxu2  ;;  %v707_v17 = vpack.c.bf16 %v678_v15, %v677_v14 }
 0x104   : > { %v581_v19 = vadd.f32 %v1969_v33, %v580_v16 }
 0x105   : > { %v543_v20 = vpop.f32.mrf.mxu0  ;;  %807 = vmatmul.bf16.gmra.mxu1 %v707_v17 }
 0x106   : > { %v662_v21 = vmul.f32 %v1972_v35, %v581_v19  ;;  %vm629_vm11 = vcmp.gt.f32.partialorder %v581_v19, 0.0  ;;  %v544_v22 = vadd.f32 %v1969_v33, %v543_v20 }
 0x108   : > { %v694_v24 = vsel %vm629_vm11, %v581_v19, %v662_v21  ;;  %v647_v27 = vmul.f32 %v1972_v35, %v544_v22  ;;  %vm614_vm12 = vcmp.gt.f32.partialorder %v544_v22, 0.0 }
 0x109   : > { %v715_v25 = vpack.c.bf16 %v694_v24, %v693_v23 }
 0x10a   : > { %v679_v32 = vsel %vm614_vm12, %v544_v22, %v647_v27 }
 0x10b   : > { %v583_v26 = vpop.f32.mrf.mxu2  ;;  %847 = vmatmul.bf16.gmra.mxu3 %v715_v25 }
 0x10c   : > { %v584_v30 = vadd.f32 %v1969_v33, %v583_v26 }
 0x10d   : > { %v545_v28 = vpop.f32.mrf.mxu0 }
 0x10e   : > { %v546_v29 = vadd.f32 %v1969_v33, %v545_v28  ;;  %v663_v38 = vmul.f32 %v1972_v35, %v584_v30  ;;  %vm630_vm14 = vcmp.gt.f32.partialorder %v584_v30, 0.0 }
 0x110   : > { %v648_v31 = vmul.f32 %v1972_v35, %v546_v29  ;;  %vm615_vm13 = vcmp.gt.f32.partialorder %v546_v29, 0.0  ;;  %v695_v43 = vsel %vm630_vm14, %v584_v30, %v663_v38 }
 0x112   : > { %v680_v34 = vsel %vm615_vm13, %v546_v29, %v648_v31 }
 0x113   : > { %v585_v36 = vpop.f32.mrf.mxu2  ;;  %v708_v37 = vpack.c.bf16 %v680_v34, %v679_v32 }
 0x114   : > { %v586_v39 = vadd.f32 %v1969_v33, %v585_v36 }
 0x115   : > { %v548_v40 = vpop.f32.mrf.mxu0  ;;  %812 = vmatmul.bf16.gmra.mxu1 %v708_v37 }
 0x116   : > { %v664_v41 = vmul.f32 %v1972_v35, %v586_v39  ;;  %vm631_vm15 = vcmp.gt.f32.partialorder %v586_v39, 0.0  ;;  %v549_v42 = vadd.f32 %v1969_v33, %v548_v40 }
 0x118   : > { %v696_v44 = vsel %vm631_vm15, %v586_v39, %v664_v41  ;;  %v649_v47 = vmul.f32 %v1972_v35, %v549_v42  ;;  %vm616_vm0 = vcmp.gt.f32.partialorder %v549_v42, 0.0 }
 0x119   : > { %v716_v45 = vpack.c.bf16 %v696_v44, %v695_v43 }
 0x11a   : > { %v681_v52 = vsel %vm616_vm0, %v549_v42, %v649_v47 }
 0x11b   : > { %v588_v46 = vpop.f32.mrf.mxu2  ;;  %852 = vmatmul.bf16.gmra.mxu3 %v716_v45 }
 0x11c   : > { %v589_v50 = vadd.f32 %v1969_v33, %v588_v46 }
 0x11d   : > { %v550_v48 = vpop.f32.mrf.mxu0 }
 0x11e   : > { %v551_v49 = vadd.f32 %v1969_v33, %v550_v48  ;;  %v665_v56 = vmul.f32 %v1972_v35, %v589_v50  ;;  %vm632_vm2 = vcmp.gt.f32.partialorder %v589_v50, 0.0 }
 0x120   : > { %v650_v51 = vmul.f32 %v1972_v35, %v551_v49  ;;  %vm617_vm1 = vcmp.gt.f32.partialorder %v551_v49, 0.0  ;;  %v697_v61 = vsel %vm632_vm2, %v589_v50, %v665_v56 }
 0x122   : > { %v682_v53 = vsel %vm617_vm1, %v551_v49, %v650_v51 }
 0x123   : > { %v590_v54 = vpop.f32.mrf.mxu2  ;;  %v709_v55 = vpack.c.bf16 %v682_v53, %v681_v52 }
 0x124   : > { %v591_v57 = vadd.f32 %v1969_v33, %v590_v54  ;;  %v2040_v54 = vld [vmem:[%s2181_s4] ss:$0 sm:$0xff] }
 0x125   : > { %v553_v58 = vpop.f32.mrf.mxu0  ;;  %817 = vmatmul.bf16.gmra.mxu1 %v709_v55 }
 0x126   : > { %v666_v59 = vmul.f32 %v1972_v35, %v591_v57  ;;  %vm633_vm3 = vcmp.gt.f32.partialorder %v591_v57, 0.0  ;;  %v554_v60 = vadd.f32 %v1969_v33, %v553_v58 }
 0x128   : > { %v698_v62 = vsel %vm633_vm3, %v591_v57, %v666_v59  ;;  %v651_v1 = vmul.f32 %v1972_v35, %v554_v60  ;;  %vm618_vm4 = vcmp.gt.f32.partialorder %v554_v60, 0.0  ;;  %v2043_v57 = vstv %s1238_s26  ;;  %s1725_s26 = scalar_lea.hbm %s2183_s6, 512 }
 0x129   : > { %v717_v63 = vpack.c.bf16 %v698_v62, %v697_v61 }
 0x12a   : > { %v683_v6 = vsel %vm618_vm4, %v554_v60, %v651_v1 }
 0x12b   : > { %v593_v0 = vpop.f32.mrf.mxu2  ;;  %857 = vmatmul.bf16.gmra.mxu3 %v717_v63 }
 0x12c   : > { %v594_v4 = vadd.f32 %v1969_v33, %v593_v0 }
 0x12d   : > { %v555_v2 = vpop.f32.mrf.mxu0 }
 0x12e   : > { %v556_v3 = vadd.f32 %v1969_v33, %v555_v2  ;;  %v667_v10 = vmul.f32 %v1972_v35, %v594_v4  ;;  %vm634_vm6 = vcmp.gt.f32.partialorder %v594_v4, 0.0 }
 0x130   : > { %v652_v5 = vmul.f32 %v1972_v35, %v556_v3  ;;  %vm619_vm5 = vcmp.gt.f32.partialorder %v556_v3, 0.0  ;;  %v699_v15 = vsel %vm634_vm6, %v594_v4, %v667_v10 }
 0x132   : > { %v684_v7 = vsel %vm619_vm5, %v556_v3, %v652_v5 }
 0x133   : > { %v595_v8 = vpop.f32.mrf.mxu2  ;;  %v710_v9 = vpack.c.bf16 %v684_v7, %v683_v6  ;;  %v339_v7 = vld [vmem:[%s1936_s16 + $0x40] sm:$0xff]  }
 0x134   : > { %v596_v11 = vadd.f32 %v1969_v33, %v595_v8 }
 0x135   : > { %v558_v12 = vpop.f32.mrf.mxu0  ;;  %822 = vmatmul.bf16.gmra.mxu1 %v710_v9 }
 0x136   : > { %v668_v13 = vmul.f32 %v1972_v35, %v596_v11  ;;  %vm635_vm7 = vcmp.gt.f32.partialorder %v596_v11, 0.0  ;;  %v559_v14 = vadd.f32 %v1969_v33, %v558_v12  ;;  %v991_v12 = vunpack.c.l.bf16 %v339_v7 }
 0x138   : > { %v700_v16 = vsel %vm635_vm7, %v596_v11, %v668_v13  ;;  %v653_v19 = vmul.f32 %v1972_v35, %v559_v14  ;;  %vm620_vm8 = vcmp.gt.f32.partialorder %v559_v14, 0.0  ;;  %v992_v13 = vunpack.c.h.bf16 %v339_v7 }
 0x139   : > { %v718_v17 = vpack.c.bf16 %v700_v16, %v699_v15  ;;  %v325_v15 = vld [vmem:[%s1936_s16 + $0x8] sm:$0xff]  }
 0x13a   : > { %v685_v24 = vsel %vm620_vm8, %v559_v14, %v653_v19 }
 0x13b   : > { %v598_v18 = vpop.f32.mrf.mxu2  ;;  %862 = vmatmul.bf16.gmra.mxu3 %v718_v17 }
 0x13c   : > { %v599_v22 = vadd.f32 %v1969_v33, %v598_v18 }
 0x13d   : > { %v560_v20 = vpop.f32.mrf.mxu0 }
 0x13e   : > { %v561_v21 = vadd.f32 %v1969_v33, %v560_v20  ;;  %v669_v28 = vmul.f32 %v1972_v35, %v599_v22  ;;  %vm636_vm10 = vcmp.gt.f32.partialorder %v599_v22, 0.0 }
 0x140   : > { %v654_v23 = vmul.f32 %v1972_v35, %v561_v21  ;;  %vm621_vm9 = vcmp.gt.f32.partialorder %v561_v21, 0.0  ;;  %v701_v34 = vsel %vm636_vm10, %v599_v22, %v669_v28  ;;  %v977_v22 = vunpack.c.l.bf16 %v325_v15 }
 0x142   : > { %v686_v25 = vsel %vm621_vm9, %v561_v21, %v654_v23 }
 0x143   : > { %v600_v26 = vpop.f32.mrf.mxu2  ;;  %v711_v27 = vpack.c.bf16 %v686_v25, %v685_v24  ;;  %v978_v24 = vunpack.c.h.bf16 %v325_v15 }
 0x144   : > { %v601_v29 = vadd.f32 %v1969_v33, %v600_v26 }
 0x145   : > { %v563_v30 = vpop.f32.mrf.mxu0  ;;  %827 = vmatmul.bf16.gmra.mxu1 %v711_v27 }
 0x146   : > { %v670_v31 = vmul.f32 %v1972_v35, %v601_v29  ;;  %vm637_vm11 = vcmp.gt.f32.partialorder %v601_v29, 0.0  ;;  %v564_v32 = vadd.f32 %v1969_v33, %v563_v30 }
 0x148   : > { %v702_v36 = vsel %vm637_vm11, %v601_v29, %v670_v31  ;;  %v655_v39 = vmul.f32 %v1972_v35, %v564_v32  ;;  %vm622_vm12 = vcmp.gt.f32.partialorder %v564_v32, 0.0 }
 0x149   : > { %v719_v37 = vpack.c.bf16 %v702_v36, %v701_v34 }
 0x14a   : > { %v687_v44 = vsel %vm622_vm12, %v564_v32, %v655_v39 }
 0x14b   : > { %v603_v38 = vpop.f32.mrf.mxu2  ;;  %867 = vmatmul.bf16.gmra.mxu3 %v719_v37  ;;  %v341_v37 = vld [vmem:[%s1936_s16 + $0x48] sm:$0xff]  }
 0x14c   : > { %v604_v42 = vadd.f32 %v1969_v33, %v603_v38 }
 0x14d   : > { %v565_v40 = vpop.f32.mrf.mxu0 }
 0x14e   : > { %v566_v41 = vadd.f32 %v1969_v33, %v565_v40  ;;  %v671_v48 = vmul.f32 %v1972_v35, %v604_v42  ;;  %vm638_vm14 = vcmp.gt.f32.partialorder %v604_v42, 0.0 }
 0x150   : > { %v656_v43 = vmul.f32 %v1972_v35, %v566_v41  ;;  %vm623_vm13 = vcmp.gt.f32.partialorder %v566_v41, 0.0  ;;  %v703_v51 = vsel %vm638_vm14, %v604_v42, %v671_v48  ;;  %v993_v42 = vunpack.c.l.bf16 %v341_v37 }
 0x152   : > { %v688_v45 = vsel %vm623_vm13, %v566_v41, %v656_v43  ;;  %v994_v43 = vunpack.c.h.bf16 %v341_v37 }
 0x153   : > { %v605_v46 = vpop.f32.mrf.mxu2  ;;  %v712_v47 = vpack.c.bf16 %v688_v45, %v687_v44  ;;  %v327_v45 = vld [vmem:[%s1936_s16 + $0x10] sm:$0xff]  }
 0x154   : > { %v606_v49 = vadd.f32 %v1969_v33, %v605_v46  ;;  %v323_v33 = vld [vmem:[%s1936_s16] sm:$0xff]  }
 0x155   : > { %832 = vmatmul.bf16.gmra.mxu1 %v712_v47  ;;  %v975_v60 = vunpack.c.l.bf16 %v323_v33  ;;  %v976_v61 = vunpack.c.h.bf16 %v323_v33 }
 0x156   : > { %v672_v50 = vmul.f32 %v1972_v35, %v606_v49  ;;  %vm639_vm15 = vcmp.gt.f32.partialorder %v606_v49, 0.0 }
 0x158   : > { %v704_v52 = vsel %vm639_vm15, %v606_v49, %v672_v50 }
 0x159   : > { %v720_v53 = vpack.c.bf16 %v704_v52, %v703_v51  ;;  %v979_v52 = vunpack.c.l.bf16 %v327_v45 }
 0x15b   : > { %872 = vmatmul.bf16.gmra.mxu3 %v720_v53 }
 0x162   : > { %v798_v55 = vpop.f32.mrf.mxu1 }
 0x163   : > { %v799_v56 = vadd.f32 %v2040_v54, %v798_v55  ;;  %v980_v55 = vunpack.c.h.bf16 %v327_v45 }
 0x165   : > { %v911_v58 = vmul.f32 %v2043_v57, %v799_v56  ;;  %vm878_vm0 = vcmp.gt.f32.partialorder %v799_v56, 0.0 }
 0x167   : > { %v943_v62 = vsel %vm878_vm0, %v799_v56, %v911_v58 }
 0x168   : > { %v1007_v2 = vadd.f32 %v975_v60, %v943_v62 }
 0x16a   : > { %v800_v35 = vpop.f32.mrf.mxu1 }
 0x16b   : > { %v801_v59 = vadd.f32 %v2040_v54, %v800_v35 }
 0x16d   : > { %vm879_vm1 = vcmp.gt.f32.partialorder %v801_v59, 0.0  ;;  %v912_v63 = vmul.f32 %v2043_v57, %v801_v59 }
 0x16e   : > { %v838_v0 = vpop.f32.mrf.mxu3 }
 0x16f   : > { %v944_v1 = vsel %vm879_vm1, %v801_v59, %v912_v63  ;;  %v839_v4 = vadd.f32 %v2040_v54, %v838_v0 }
 0x170   : > { %v1008_v3 = vadd.f32 %v976_v61, %v944_v1  ;;  %v343_v1 = vld [vmem:[%s1936_s16 + $0x50] sm:$0xff]  }
 0x171   : > { %v927_v8 = vmul.f32 %v2043_v57, %v839_v4  ;;  %vm894_vm2 = vcmp.gt.f32.partialorder %v839_v4, 0.0  ;;  %v996_v7 = vunpack.c.h.bf16 %v343_v1 }
 0x172   : > { %v1409_v5 = vpack.c.bf16 %v1008_v3, %v1007_v2  ;;  %v803_v6 = vpop.f32.mrf.mxu1 }
 0x173   : > { %v804_v9 = vadd.f32 %v2040_v54, %v803_v6  ;;  %v959_v14 = vsel %vm894_vm2, %v839_v4, %v927_v8  ;;  %v995_v6 = vunpack.c.l.bf16 %v343_v1 }
 0x174   : > { %1410 = vst [vmem:[%s2052_s13] sm:$0xff] %v1409_v5   ;;  %v1023_v21 = vadd.f32 %v991_v12, %v959_v14 }
 0x175   : > { %v913_v16 = vmul.f32 %v2043_v57, %v804_v9  ;;  %vm880_vm4 = vcmp.gt.f32.partialorder %v804_v9, 0.0 }
 0x176   : > { %v840_v10 = vpop.f32.mrf.mxu3 }
 0x177   : > { %v841_v11 = vadd.f32 %v2040_v54, %v840_v10  ;;  %v945_v25 = vsel %vm880_vm4, %v804_v9, %v913_v16  ;;  %v329_v9 = vld [vmem:[%s1936_s16 + $0x18] sm:$0xff]  }
 0x178   : > { %v1009_v30 = vadd.f32 %v977_v22, %v945_v25  ;;  %v981_v16 = vunpack.c.l.bf16 %v329_v9 }
 0x179   : > { %vm895_vm3 = vcmp.gt.f32.partialorder %v841_v11, 0.0  ;;  %v928_v17 = vmul.f32 %v2043_v57, %v841_v11 }
 0x17a   : > { %v805_v18 = vpop.f32.mrf.mxu1 }
 0x17b   : > { %v960_v19 = vsel %vm895_vm3, %v841_v11, %v928_v17  ;;  %v806_v20 = vadd.f32 %v2040_v54, %v805_v18  ;;  %v982_v18 = vunpack.c.h.bf16 %v329_v9 }
 0x17c   : > { %v1024_v23 = vadd.f32 %v992_v13, %v960_v19 }
 0x17d   : > { %vm881_vm5 = vcmp.gt.f32.partialorder %v806_v20, 0.0  ;;  %v914_v26 = vmul.f32 %v2043_v57, %v806_v20 }
 0x17e   : > { %v1449_v27 = vpack.c.bf16 %v1024_v23, %v1023_v21  ;;  %v843_v28 = vpop.f32.mrf.mxu3 }
 0x17f   : > { %v946_v29 = vsel %vm881_vm5, %v806_v20, %v914_v26  ;;  %v844_v32 = vadd.f32 %v2040_v54, %v843_v28 }
 0x180   : > { %1493 = vst [vmem:[%s2052_s13 + $0x40] sm:$0xff] %v1449_v27   ;;  %v1010_v31 = vadd.f32 %v978_v24, %v946_v29  ;;  %v345_v29 = vld [vmem:[%s1936_s16 + $0x58] sm:$0xff]  }
 0x181   : > { %v929_v38 = vmul.f32 %v2043_v57, %v844_v32  ;;  %vm896_vm6 = vcmp.gt.f32.partialorder %v844_v32, 0.0  ;;  %v998_v37 = vunpack.c.h.bf16 %v345_v29 }
 0x182   : > { %v1414_v34 = vpack.c.bf16 %v1010_v31, %v1009_v30  ;;  %v808_v36 = vpop.f32.mrf.mxu1 }
 0x183   : > { %v809_v39 = vadd.f32 %v2040_v54, %v808_v36  ;;  %v961_v44 = vsel %vm896_vm6, %v844_v32, %v929_v38  ;;  %v997_v36 = vunpack.c.l.bf16 %v345_v29 }
 0x184   : > { %1486 = vst [vmem:[%s2052_s13 + $0x8] sm:$0xff] %v1414_v34   ;;  %v1025_v51 = vadd.f32 %v993_v42, %v961_v44 }
 0x185   : > { %v915_v46 = vmul.f32 %v2043_v57, %v809_v39  ;;  %vm882_vm8 = vcmp.gt.f32.partialorder %v809_v39, 0.0 }
 0x186   : > { %v845_v40 = vpop.f32.mrf.mxu3 }
 0x187   : > { %v846_v41 = vadd.f32 %v2040_v54, %v845_v40  ;;  %v947_v56 = vsel %vm882_vm8, %v809_v39, %v915_v46  ;;  %v331_v39 = vld [vmem:[%s1936_s16 + $0x20] sm:$0xff]  }
 0x188   : > { %v1011_v60 = vadd.f32 %v979_v52, %v947_v56  ;;  %v983_v46 = vunpack.c.l.bf16 %v331_v39 }
 0x189   : > { %vm897_vm7 = vcmp.gt.f32.partialorder %v846_v41, 0.0  ;;  %v930_v47 = vmul.f32 %v2043_v57, %v846_v41 }
 0x18a   : > { %v810_v48 = vpop.f32.mrf.mxu1 }
 0x18b   : > { %v962_v49 = vsel %vm897_vm7, %v846_v41, %v930_v47  ;;  %v811_v50 = vadd.f32 %v2040_v54, %v810_v48  ;;  %v984_v48 = vunpack.c.h.bf16 %v331_v39 }
 0x18c   : > { %v1026_v53 = vadd.f32 %v994_v43, %v962_v49 }
 0x18d   : > { %vm883_vm9 = vcmp.gt.f32.partialorder %v811_v50, 0.0  ;;  %v916_v33 = vmul.f32 %v2043_v57, %v811_v50 }
 0x18e   : > { %v1454_v58 = vpack.c.bf16 %v1026_v53, %v1025_v51  ;;  %v848_v35 = vpop.f32.mrf.mxu3 }
 0x18f   : > { %v948_v59 = vsel %vm883_vm9, %v811_v50, %v916_v33  ;;  %v849_v62 = vadd.f32 %v2040_v54, %v848_v35 }
 0x190   : > { %1494 = vst [vmem:[%s2052_s13 + $0x48] sm:$0xff] %v1454_v58   ;;  %v1012_v61 = vadd.f32 %v980_v55, %v948_v59  ;;  %v347_v59 = vld [vmem:[%s1936_s16 + $0x60] sm:$0xff]  }
 0x191   : > { %v931_v2 = vmul.f32 %v2043_v57, %v849_v62  ;;  %vm898_vm10 = vcmp.gt.f32.partialorder %v849_v62, 0.0  ;;  %v1000_v1 = vunpack.c.h.bf16 %v347_v59 }
 0x192   : > { %v1419_v63 = vpack.c.bf16 %v1012_v61, %v1011_v60  ;;  %v813_v0 = vpop.f32.mrf.mxu1 }
 0x193   : > { %v814_v3 = vadd.f32 %v2040_v54, %v813_v0  ;;  %v963_v8 = vsel %vm898_vm10, %v849_v62, %v931_v2  ;;  %v999_v0 = vunpack.c.l.bf16 %v347_v59 }
 0x194   : > { %1487 = vst [vmem:[%s2052_s13 + $0x10] sm:$0xff] %v1419_v63   ;;  %v1027_v15 = vadd.f32 %v995_v6, %v963_v8 }
 0x195   : > { %v917_v10 = vmul.f32 %v2043_v57, %v814_v3  ;;  %vm884_vm12 = vcmp.gt.f32.partialorder %v814_v3, 0.0 }
 0x196   : > { %v850_v4 = vpop.f32.mrf.mxu3 }
 0x197   : > { %v851_v5 = vadd.f32 %v2040_v54, %v850_v4  ;;  %v949_v19 = vsel %vm884_vm12, %v814_v3, %v917_v10  ;;  %v333_v3 = vld [vmem:[%s1936_s16 + $0x28] sm:$0xff]  }
 0x198   : > { %v1013_v24 = vadd.f32 %v981_v16, %v949_v19  ;;  %v985_v10 = vunpack.c.l.bf16 %v333_v3 }
 0x199   : > { %vm899_vm11 = vcmp.gt.f32.partialorder %v851_v5, 0.0  ;;  %v932_v11 = vmul.f32 %v2043_v57, %v851_v5 }
 0x19a   : > { %v815_v12 = vpop.f32.mrf.mxu1 }
 0x19b   : > { %v964_v13 = vsel %vm899_vm11, %v851_v5, %v932_v11  ;;  %v816_v14 = vadd.f32 %v2040_v54, %v815_v12  ;;  %v986_v12 = vunpack.c.h.bf16 %v333_v3 }
 0x19c   : > { %v1028_v17 = vadd.f32 %v996_v7, %v964_v13 }
 0x19d   : > { %vm885_vm13 = vcmp.gt.f32.partialorder %v816_v14, 0.0  ;;  %v918_v20 = vmul.f32 %v2043_v57, %v816_v14 }
 0x19e   : > { %v1459_v21 = vpack.c.bf16 %v1028_v17, %v1027_v15  ;;  %v853_v22 = vpop.f32.mrf.mxu3 }
 0x19f   : > { %v950_v23 = vsel %vm885_vm13, %v816_v14, %v918_v20  ;;  %v854_v26 = vadd.f32 %v2040_v54, %v853_v22 }
 0x1a0   : > { %1495 = vst [vmem:[%s2052_s13 + $0x50] sm:$0xff] %v1459_v21   ;;  %v1014_v25 = vadd.f32 %v982_v18, %v950_v23  ;;  %v349_v23 = vld [vmem:[%s1936_s16 + $0x68] sm:$0xff]  }
 0x1a1   : > { %v933_v30 = vmul.f32 %v2043_v57, %v854_v26  ;;  %vm900_vm14 = vcmp.gt.f32.partialorder %v854_v26, 0.0  ;;  %v1002_v29 = vunpack.c.h.bf16 %v349_v23 }
 0x1a2   : > { %v1424_v27 = vpack.c.bf16 %v1014_v25, %v1013_v24  ;;  %v818_v28 = vpop.f32.mrf.mxu1 }
 0x1a3   : > { %v819_v31 = vadd.f32 %v2040_v54, %v818_v28  ;;  %v965_v38 = vsel %vm900_vm14, %v854_v26, %v933_v30  ;;  %v1001_v28 = vunpack.c.l.bf16 %v349_v23 }
 0x1a4   : > { %1488 = vst [vmem:[%s2052_s13 + $0x18] sm:$0xff] %v1424_v27   ;;  %v1029_v45 = vadd.f32 %v997_v36, %v965_v38 }
 0x1a5   : > { %v919_v40 = vmul.f32 %v2043_v57, %v819_v31  ;;  %vm886_vm0 = vcmp.gt.f32.partialorder %v819_v31, 0.0 }
 0x1a6   : > { %v855_v32 = vpop.f32.mrf.mxu3 }
 0x1a7   : > { %v856_v34 = vadd.f32 %v2040_v54, %v855_v32  ;;  %v951_v49 = vsel %vm886_vm0, %v819_v31, %v919_v40  ;;  %v335_v31 = vld [vmem:[%s1936_s16 + $0x30] sm:$0xff]  }
 0x1a8   : > { %v1015_v55 = vadd.f32 %v983_v46, %v951_v49  ;;  %v987_v40 = vunpack.c.l.bf16 %v335_v31 }
 0x1a9   : > { %vm901_vm15 = vcmp.gt.f32.partialorder %v856_v34, 0.0  ;;  %v934_v41 = vmul.f32 %v2043_v57, %v856_v34 }
 0x1aa   : > { %v820_v42 = vpop.f32.mrf.mxu1 }
 0x1ab   : > { %v966_v43 = vsel %vm901_vm15, %v856_v34, %v934_v41  ;;  %v821_v44 = vadd.f32 %v2040_v54, %v820_v42  ;;  %v988_v42 = vunpack.c.h.bf16 %v335_v31 }
 0x1ac   : > { %v1030_v47 = vadd.f32 %v998_v37, %v966_v43 }
 0x1ad   : > { %vm887_vm1 = vcmp.gt.f32.partialorder %v821_v44, 0.0  ;;  %v920_v50 = vmul.f32 %v2043_v57, %v821_v44 }
 0x1ae   : > { %v1464_v51 = vpack.c.bf16 %v1030_v47, %v1029_v45  ;;  %v858_v52 = vpop.f32.mrf.mxu3 }
 0x1af   : > { %v952_v53 = vsel %vm887_vm1, %v821_v44, %v920_v50  ;;  %v859_v33 = vadd.f32 %v2040_v54, %v858_v52 }
 0x1b0   : > { %1496 = vst [vmem:[%s2052_s13 + $0x58] sm:$0xff] %v1464_v51   ;;  %v1016_v56 = vadd.f32 %v984_v48, %v952_v53  ;;  %v351_v53 = vld [vmem:[%s1936_s16 + $0x70] sm:$0xff]  }
 0x1b1   : > { %v935_v60 = vmul.f32 %v2043_v57, %v859_v33  ;;  %vm902_vm2 = vcmp.gt.f32.partialorder %v859_v33, 0.0  ;;  %v1004_v59 = vunpack.c.h.bf16 %v351_v53 }
 0x1b2   : > { %v1429_v58 = vpack.c.bf16 %v1016_v56, %v1015_v55  ;;  %v823_v35 = vpop.f32.mrf.mxu1 }
 0x1b3   : > { %v824_v61 = vadd.f32 %v2040_v54, %v823_v35  ;;  %v967_v2 = vsel %vm902_vm2, %v859_v33, %v935_v60  ;;  %v1003_v35 = vunpack.c.l.bf16 %v351_v53 }
 0x1b4   : > { %1489 = vst [vmem:[%s2052_s13 + $0x20] sm:$0xff] %v1429_v58   ;;  %v1031_v9 = vadd.f32 %v999_v0, %v967_v2 }
 0x1b5   : > { %v921_v4 = vmul.f32 %v2043_v57, %v824_v61  ;;  %vm888_vm4 = vcmp.gt.f32.partialorder %v824_v61, 0.0 }
 0x1b6   : > { %v860_v62 = vpop.f32.mrf.mxu3 }
 0x1b7   : > { %v861_v63 = vadd.f32 %v2040_v54, %v860_v62  ;;  %v953_v13 = vsel %vm888_vm4, %v824_v61, %v921_v4  ;;  %v337_v61 = vld [vmem:[%s1936_s16 + $0x38] sm:$0xff]  }
 0x1b8   : > { %v1017_v18 = vadd.f32 %v985_v10, %v953_v13  ;;  %v989_v4 = vunpack.c.l.bf16 %v337_v61 }
 0x1b9   : > { %vm903_vm3 = vcmp.gt.f32.partialorder %v861_v63, 0.0  ;;  %v936_v5 = vmul.f32 %v2043_v57, %v861_v63 }
 0x1ba   : > { %v825_v6 = vpop.f32.mrf.mxu1 }
 0x1bb   : > { %v968_v7 = vsel %vm903_vm3, %v861_v63, %v936_v5  ;;  %v826_v8 = vadd.f32 %v2040_v54, %v825_v6  ;;  %v990_v6 = vunpack.c.h.bf16 %v337_v61 }
 0x1bc   : > { %v1032_v11 = vadd.f32 %v1000_v1, %v968_v7 }
 0x1bd   : > { %vm889_vm5 = vcmp.gt.f32.partialorder %v826_v8, 0.0  ;;  %v922_v14 = vmul.f32 %v2043_v57, %v826_v8 }
 0x1be   : > { %v1469_v15 = vpack.c.bf16 %v1032_v11, %v1031_v9  ;;  %v863_v16 = vpop.f32.mrf.mxu3 }
 0x1bf   : > { %v954_v17 = vsel %vm889_vm5, %v826_v8, %v922_v14  ;;  %v864_v20 = vadd.f32 %v2040_v54, %v863_v16  ;;  %v353_v16 = vld [vmem:[%s1936_s16 + $0x78] sm:$0xff]   ;;  %s1719_s16 = sshra.s32 %s1119_s14, 4  ;;  %s1720_s16 = int_to_ptr.hbm [resolvable:$true] %s1719_s16 }
 0x1c0   : > { %1497 = vst [vmem:[%s2052_s13 + $0x60] sm:$0xff] %v1469_v15   ;;  %v1018_v19 = vadd.f32 %v986_v12, %v954_v17  ;;  %s1721_s27 = scalar_lea.hbm %s1720_s16, 128  ;;  %p1726_p7 = scmp.lt.s32.totalorder %s1720_s16, %s2183_s6 }
 0x1c1   : > { %v937_v24 = vmul.f32 %v2043_v57, %v864_v20  ;;  %vm904_vm6 = vcmp.gt.f32.partialorder %v864_v20, 0.0  ;;  %p1722_p1 = scmp.ne.s32.totalorder %s1720_s16, %s1721_s27  ;;  %p1727_p2 = scmp.lt.s32.totalorder %s1725_s26, %s1721_s27 }
 0x1c2   : > { %v1434_v21 = vpack.c.bf16 %v1018_v19, %v1017_v18  ;;  %v828_v22 = vpop.f32.mrf.mxu1 }
 0x1c3   : > { %v829_v25 = vadd.f32 %v2040_v54, %v828_v22  ;;  %v969_v30 = vsel %vm904_vm6, %v864_v20, %v937_v24  ;;  %v1005_v20 = vunpack.c.l.bf16 %v353_v16  ;;  %p1723_p4 = pnand %p1722_p1, %p1900_p0  ;;  %p1728_p9 = por %p1727_p2, %p1726_p7 }
 0x1c4   : > { %1490 = vst [vmem:[%s2052_s13 + $0x28] sm:$0xff] %v1434_v21   ;;  %v1033_v39 = vadd.f32 %v1001_v28, %v969_v30  ;;  %v1006_v21 = vunpack.c.h.bf16 %v353_v16 }
 0x1c5   : > { %v923_v32 = vmul.f32 %v2043_v57, %v829_v25  ;;  %vm890_vm8 = vcmp.gt.f32.partialorder %v829_v25, 0.0  ;;  %p1724_p8 = pneg %p1723_p4 }
 0x1c6   : > { %v865_v26 = vpop.f32.mrf.mxu3 }
 0x1c7   : > { %v866_v27 = vadd.f32 %v2040_v54, %v865_v26  ;;  %v955_v43 = vsel %vm890_vm8, %v829_v25, %v923_v32  ;;  %p1729_p10 = pnand %p1728_p9, %p1724_p8 }
 0x1c8   : > { %v1019_v48 = vadd.f32 %v987_v40, %v955_v43 }
 0x1c9   : > { %vm905_vm7 = vcmp.gt.f32.partialorder %v866_v27, 0.0  ;;  %v938_v34 = vmul.f32 %v2043_v57, %v866_v27 }
 0x1ca   : > { %v830_v36 = vpop.f32.mrf.mxu1 }
 0x1cb   : > { %v970_v37 = vsel %vm905_vm7, %v866_v27, %v938_v34  ;;  %v831_v38 = vadd.f32 %v2040_v54, %v830_v36 }
 0x1cc   : > { %v1034_v41 = vadd.f32 %v1002_v29, %v970_v37 }
 0x1cd   : > { %vm891_vm9 = vcmp.gt.f32.partialorder %v831_v38, 0.0  ;;  %v924_v44 = vmul.f32 %v2043_v57, %v831_v38 }
 0x1ce   : > { %v1474_v45 = vpack.c.bf16 %v1034_v41, %v1033_v39  ;;  %v868_v46 = vpop.f32.mrf.mxu3 }
 0x1cf   : > { %v956_v47 = vsel %vm891_vm9, %v831_v38, %v924_v44  ;;  %v869_v50 = vadd.f32 %v2040_v54, %v868_v46 }
 0x1d0   : > { %1498 = vst [vmem:[%s2052_s13 + $0x68] sm:$0xff] %v1474_v45   ;;  %v1020_v49 = vadd.f32 %v988_v42, %v956_v47 }
 0x1d1   : > { %v939_v55 = vmul.f32 %v2043_v57, %v869_v50  ;;  %vm906_vm10 = vcmp.gt.f32.partialorder %v869_v50, 0.0 }
 0x1d2   : > { %v1439_v51 = vpack.c.bf16 %v1020_v49, %v1019_v48  ;;  %v833_v52 = vpop.f32.mrf.mxu1 }
 0x1d3   : > { %v834_v56 = vadd.f32 %v2040_v54, %v833_v52  ;;  %v971_v60 = vsel %vm906_vm10, %v869_v50, %v939_v55 }
 0x1d4   : > { %1491 = vst [vmem:[%s2052_s13 + $0x30] sm:$0xff] %v1439_v51   ;;  %v1035_v3 = vadd.f32 %v1003_v35, %v971_v60 }
 0x1d5   : > { %v925_v62 = vmul.f32 %v2043_v57, %v834_v56  ;;  %vm892_vm12 = vcmp.gt.f32.partialorder %v834_v56, 0.0 }
 0x1d6   : > { %v870_v33 = vpop.f32.mrf.mxu3 }
 0x1d7   : > { %v871_v58 = vadd.f32 %v2040_v54, %v870_v33  ;;  %v957_v7 = vsel %vm892_vm12, %v834_v56, %v925_v62 }
 0x1d8   : > { %v1021_v12 = vadd.f32 %v989_v4, %v957_v7 }
 0x1d9   : > { %vm907_vm11 = vcmp.gt.f32.partialorder %v871_v58, 0.0  ;;  %v940_v63 = vmul.f32 %v2043_v57, %v871_v58 }
 0x1da   : > { %v835_v0 = vpop.f32.mrf.mxu1 }
 0x1db   : > { %v972_v1 = vsel %vm907_vm11, %v871_v58, %v940_v63  ;;  %v836_v2 = vadd.f32 %v2040_v54, %v835_v0 }
 0x1dc   : > { %v1036_v5 = vadd.f32 %v1004_v59, %v972_v1 }
 0x1dd   : > { %vm893_vm13 = vcmp.gt.f32.partialorder %v836_v2, 0.0  ;;  %v926_v8 = vmul.f32 %v2043_v57, %v836_v2 }
 0x1de   : > { %v1479_v9 = vpack.c.bf16 %v1036_v5, %v1035_v3  ;;  %v873_v10 = vpop.f32.mrf.mxu3 }
 0x1df   : > { %v958_v11 = vsel %vm893_vm13, %v836_v2, %v926_v8  ;;  %v874_v14 = vadd.f32 %v2040_v54, %v873_v10 }
 0x1e0   : > { %1499 = vst [vmem:[%s2052_s13 + $0x70] sm:$0xff] %v1479_v9   ;;  %v1022_v13 = vadd.f32 %v990_v6, %v958_v11 }
 0x1e1   : > { %v941_v17 = vmul.f32 %v2043_v57, %v874_v14  ;;  %vm908_vm14 = vcmp.gt.f32.partialorder %v874_v14, 0.0 }
 0x1e2   : > { %v1444_v15 = vpack.c.bf16 %v1022_v13, %v1021_v12 }
 0x1e3   : > { %v973_v22 = vsel %vm908_vm14, %v874_v14, %v941_v17 }
 0x1e4   : > { %1492 = vst [vmem:[%s2052_s13 + $0x38] sm:$0xff] %v1444_v15   ;;  %v1037_v25 = vadd.f32 %v1005_v20, %v973_v22 }
 0x1e6   : > { %v875_v18 = vpop.f32.mrf.mxu3 }
 0x1e7   : > { %v876_v19 = vadd.f32 %v2040_v54, %v875_v18 }
 0x1e9   : > { %vm909_vm15 = vcmp.gt.f32.partialorder %v876_v19, 0.0  ;;  %v942_v23 = vmul.f32 %v2043_v57, %v876_v19 }
 0x1eb   : > { %v974_v24 = vsel %vm909_vm15, %v876_v19, %v942_v23 }
 0x1ec   : > { %v1038_v26 = vadd.f32 %v1006_v21, %v974_v24 }
 0x1ee   : > { %v1484_v54 = vpack.c.bf16 %v1038_v26, %v1037_v25 }
 0x1f0   : > { %1500 = vst [vmem:[%s2052_s13 + $0x78] sm:$0xff] %v1484_v54  }
 0x1f1   : > { %1732 = shalt.err (!%p1729_p10)
}
 0x1f2   : > { %s1786_s12 = smov 64   ;;  %s1787_s13 = smov 4  }
 0x1f3   : > { %1531 = dma.vmem_to_hbm [thread:$0]  (%p1900_p0), %s1117_s25, 2048, %s1119_s14, %s1104_s15, %s1786_s12, %s1786_s12, %s1787_s13  }
 0x1f4 PF: > { %p1558_p11 = scmp.ge.s32.totalorder %s1779_s24, 2  ;;  %s1133_s17 = sand.u32 1, %s1767_s21  }
 0x1f5   : > { %s1134_s18 = scalar_lea.sflag [#allocation4], %s1133_s17 }
 0x1f6   : > { %p1548_p12 = pnand %p1558_p11, %p1858_p6 }
 0x1f8   : > { %p1549_p13 = pneg %p1548_p12 }
 0x1fa   : > { %1762 = dma.done.wait (%p1549_p13), %s1134_s18, 2048  }
 0x1fb   : > { %1764 = vsyncadd (%p1549_p13), %s1134_s18, 4294965248  ;;  %p21_p3 = scmp.ge.s32.totalorder %s1887_s29, 6   ;;  %s2193_s21 = smov %s1771_s22 }
 0x1fc   : > { %s2194_s22 = smov %s1775_s23  ;;  %s2195_s23 = smov %s1896_s9 }
 0x1fd   : > { %s2196_s24 = smov %s1887_s29  ;;  %23 = sbr.rel (!%p21_p3) target bundleno = 7 (0x7), region = 102 }
 0x202   :  { %1140 = vsyncpa [#allocation3], 1 }
 0x203   :  { %1142 = vsyncpa [#allocation3 + $0x1], 1 }
 0x204   :  { %1143 = vsyncpa [#allocation7], 1 }
 0x205   :  { %1144 = vsyncpa [#allocation4], 1 }
 0x206   :  { %1146 = vsyncpa [#allocation4 + $0x1], 1 }
 0x207   :  { %1147 = vsyncpa [#allocation5], 1 }
 0x208   :  { %1149 = vsyncpa [#allocation5 + $0x1], 1 }

// kernel: tpu_custom_call.1
= control target key start
LH: loop header
LB: loop body
LE: loop exit
PB: predicated region body
PF: predicated region fallthrough
CT: control target
= control target key end

     0   :  { %11 = vsyncpa [#allocation3], 0  ;;  %s2177_s0 = inlined_call_operand.hbm [shape: bf16[1024,128], index: 0, kind: input, shape index: {}]   ;;  %s2178_s1 = inlined_call_operand.hbm [shape: bf16[128,128], index: 1, kind: input, shape index: {}]   ;;  %s2179_s2 = inlined_call_operand.vmem [shape: f32[1,128], index: 2, kind: input, shape index: {}]   ;;  %s2180_s3 = inlined_call_operand.hbm [shape: bf16[128,128], index: 3, kind: input, shape index: {}]   ;;  %s2181_s4 = inlined_call_operand.vmem [shape: f32[1,128], index: 4, kind: input, shape index: {}]   ;;  %s2182_s5 = inlined_call_operand.vmem [shape: f32[2], index: 5, kind: input, shape index: {}]   ;;  %s2183_s6 = inlined_call_operand.hbm [shape: bf16[1024,128], index: 6, kind: output, shape index: {}]  }
   0x1   :  { %13 = vsyncpa [#allocation3 + $0x1], 0 }
   0x2   :  { %14 = vsyncpa [#allocation7], 0 }
   0x3   :  { %15 = vsyncpa [#allocation5], 0 }
   0x4   :  { %16 = vsyncpa [#allocation4], 0 }
   0x5   :  { %18 = vsyncpa [#allocation4 + $0x1], 0  ;;  %s1823_s21 = smov 0   ;;  %s1825_s22 = smov 0  }
   0x6   :  { %s1827_s23 = smov 0   ;;  %s1829_s24 = smov 0  }
   0x7 LB: > { %s1844_s25 = sadd.s32 4294967295, %s1779_s24   ;;  %s1223_s26 = sadd.s32 4294967294, %s1779_s24   ;;  %s1779_s24 = sphi %s1829_s24, %s2196_s24   ;;  %s1775_s23 = sphi %s1827_s23, %s2195_s23   ;;  %s1771_s22 = sphi %s1825_s22, %s2194_s22   ;;  %s1767_s21 = sphi %s1823_s21, %s2193_s21  }
   0x8   : > { %p44_p0 = scmp.ne.s32.totalorder %s1771_s22, %s1767_s21  ;;  %p45_p1 = scmp.eq.s32.totalorder %s1844_s25, 0 }
   0x9   : > { %p173_p2 = scmp.eq.s32.totalorder %s1844_s25, 3  ;;  %p179_p3 = scmp.eq.s32.totalorder %s1223_s26, 3 }
   0xa   : > { %p1853_p4 = por %p45_p1, %p44_p0  ;;  %p1224_p5 = scmp.ge.s32.totalorder %s1779_s24, 1 }
   0xb   : > { %p1858_p6 = por %p179_p3, %p44_p0  ;;  %p186_p7 = scmp.lt.s32.totalorder %s1779_s24, 5 }
   0xc   : > { %s197_s7 = sshll.u32 %s2178_s1, 4  ;;  %s1781_s9 = smov [#allocation6]   ;;  %s198_s7 = int_to_ptr.hbm [resolvable:$true] %s197_s7 }
   0xd   : > { %p1866_p8 = pnand %p1224_p5, %p186_p7  ;;  %s199_s10 = sshll.u32 %s1781_s9, 4  ;;  %s200_s10 = int_to_ptr.vmem [resolvable:$true] %s199_s10 }
   0xe   : > { %s214_s13 = sshll.u32 %s2180_s3, 4  ;;  %s2184_s14 = smov 64   ;;  %s215_s13 = int_to_ptr.hbm [resolvable:$true] %s214_s13 }
   0xf   : > { %p1533_p9 = pneg %p1866_p8  ;;  %s2185_s15 = smov 4  }
  0x10   : > { %s1784_s16 = smov [#allocation8]   ;;  %s232_s20 = sshll.u32 %s2182_s5, 4  ;;  %s233_s20 = int_to_ptr.vmem [resolvable:$true] %s232_s20 }
  0x11   : > { %p1534_p10 = pnand %p1533_p9, %p45_p1  ;;  %s216_s17 = sshll.u32 %s1784_s16, 4  ;;  %s217_s17 = int_to_ptr.vmem [resolvable:$true] %s216_s17 }
  0x12   : > { %s1785_s26 = smov [#allocation9]   ;;  %s1887_s29 = sadd.s32 1, %s1779_s24  }
  0x13   : > { %1536 = dma.hbm_to_vmem [thread:$0]  (!%p1534_p10), %s198_s7, 1024, %s200_s10, [#allocation7], %s2184_s14, %s2184_s14, %s2185_s15  }
  0x14   : > { %1539 = dma.hbm_to_vmem [thread:$0]  (!%p1534_p10), %s215_s13, 1024, %s217_s17, [#allocation7], %s2184_s14, %s2184_s14, %s2185_s15  }
  0x15   : > { %1542 = dma.vmem_to_smem (!%p1534_p10), %s233_s20, 16, %s1785_s26, [#allocation5]  }
  0x16   : > { %s28_s30 = ssub.s32 %s1779_s24, %s1887_s29  ;;  %s31_s7 = sadd.s32 1, %s1775_s23 }
  0x17   : > { %p29_p11 = scmp.eq.s32.totalorder %s28_s30, 0  ;;  %p38_p12 = scmp.ne.s32.totalorder %s1775_s23, %s1771_s22 }
  0x18   : > { %p39_p13 = scmp.eq.s32.totalorder %s1779_s24, 0  ;;  %p1554_p3 = scmp.lt.s32.totalorder %s1779_s24, 4 }
  0x19   : > { %s1896_s9 = scalar_select %p29_p11, %s1775_s23, %s31_s7  }
  0x1a   : > { %p1900_p0 = por %p173_p2, %p38_p12  ;;  %s243_s11 = sand.u32 1, %s1775_s23  }
  0x1b   : > { %s1372_s12 = sshll.u32 %s1779_s24, 7  ;;  %p40_p5 = por %p39_p13, %p38_p12 }
  0x1c   : > { %s1229_s13 = sshll.u32 %s243_s11, 7  ;;  %s252_s18 = scalar_lea.hbm %s2177_s0, %s1372_s12 }
  0x1d   : > { %s253_s19 = sshll.u32 %s252_s18, 4  ;;  %s247_s20 = scalar_lea.vmem [#allocation2], %s1229_s13  ;;  %s254_s19 = int_to_ptr.hbm [resolvable:$true] %s253_s19 }
  0x1e   : > { %s255_s26 = sshll.u32 %s247_s20, 4  ;;  %p1910_p7 = pnand %p1554_p3, %p40_p5  ;;  %s256_s26 = int_to_ptr.vmem [resolvable:$true] %s255_s26 }
  0x1f   : > { %s244_s7 = scalar_lea.sflag [#allocation3], %s243_s11  ;;  %s1675_s14 = sshra.s32 %s254_s19, 4  ;;  %s1676_s14 = int_to_ptr.hbm [resolvable:$true] %s1675_s14 }
  0x20   : > { %s1677_s15 = scalar_lea.hbm %s1676_s14, 128  ;;  %p1679_p9 = pneg %p1910_p7 }
  0x21   : > { %p1678_p2 = scmp.ne.s32.totalorder %s1676_s14, %s1677_s15  ;;  %s1682_s13 = scalar_lea.hbm %s2177_s0, 512 }
  0x22   : > { %p1683_p12 = scmp.lt.s32.totalorder %s1676_s14, %s2177_s0  ;;  %p1684_p13 = scmp.lt.s32.totalorder %s1682_s13, %s1677_s15 }
  0x23   : > { %p1680_p10 = pnand %p1679_p9, %p1678_p2 }
  0x24   : > { %p1685_p3 = por %p1684_p13, %p1683_p12 }
  0x25   : > { %p1681_p11 = pneg %p1680_p10 }
  0x27   : > { %p1686_p5 = pnand %p1685_p3, %p1681_p11 }
  0x29   : > { %1689 = shalt.err (!%p1686_p5)
}
  0x2a   : > { %s2191_s11 = smov 4   ;;  %s2192_s20 = smov 64  }
  0x2b   : > { %1546 = dma.hbm_to_vmem [thread:$0]  (!%p1910_p7), %s254_s19, 2048, %s256_s26, %s244_s7, %s2192_s20, %s2192_s20, %s2191_s11  }
  0x2c   : > { %267 = sbr.rel (%p1866_p8) target bundleno = 500 (0x1f4), region = 44  ;;  %s1930_s12 = sand.u32 (!%p1866_p8), 1, %s1771_s22  }
  0x2d   : > { %s1233_s14 = sshll.u32 (!%p1866_p8), %s1930_s12, 7  ;;  %s270_s15 = scalar_lea.sflag (!%p1866_p8), [#allocation3], %s1930_s12 }
  0x2e   : > { %s1936_s16 = scalar_lea.vmem (!%p1866_p8), [#allocation2], %s1233_s14 }
  0x31   : > { %1750 = dma.done.wait (%p1853_p4), %s270_s15, 2048  }
  0x32   : > { %1752 = vsyncadd (%p1853_p4), %s270_s15, 4294965248 }
  0x33   : > { %1754 = dma.done.wait (%p45_p1), [#allocation7], 2048  }
  0x34   : > { %1756 = vsyncadd (%p45_p1), [#allocation7], 4294965248 }
  0x35   : > { %1758 = dma.done.wait (%p45_p1), [#allocation5], 16  }
  0x36   : > { %1760 = vsyncadd (%p45_p1), [#allocation5], 4294967280 }
  0x37   : > { %294 = sfence }
  0x38   : > { %v1396_v0 = vld [vmem:[#allocation6 + $0x38] sm:$0xff]  ;;  %v1395_v1 = vld [vmem:[#allocation6 + $0x30] sm:$0xff]  ;;  %v1394_v2 = vld [vmem:[#allocation6 + $0x28] sm:$0xff]  ;;  %s321_s27 = sld [smem:[#allocation9]]  ;;  %s2052_s13 = scalar_lea.vmem [#allocation10], %s1233_s14 }
  0x39   : > { %519 = vmatpush.bf16.msra.mxu0 %v1396_v0  ;;  %1501 = vmatpush.bf16.msra.mxu2 %v1396_v0  ;;  %v1393_v3 = vld [vmem:[#allocation6 + $0x20] sm:$0xff]  ;;  %v1392_v4 = vld [vmem:[#allocation6 + $0x18] sm:$0xff]  ;;  %v1391_v5 = vld [vmem:[#allocation6 + $0x10] sm:$0xff]  ;;  %s1238_s26 = sld [smem:[#allocation9 + $0x1]]  ;;  %s1405_s17 = sshll.u32 %s1844_s25, 7 }
  0x3a   : > { %v1390_v6 = vld [vmem:[#allocation6 + $0x8] sm:$0xff]  ;;  %v1389_v7 = vld [vmem:[#allocation6] sm:$0xff]  ;;  %v1375_v12 = vld [vmem:[%s1936_s16 + $0x10] sm:$0xff]  ;;  %s1115_s20 = scalar_lea.hbm %s2183_s6, %s1405_s17  ;;  %s1116_s25 = sshll.u32 %s2052_s13, 4  ;;  %s1117_s25 = int_to_ptr.vmem [resolvable:$true] %s1116_s25 }
  0x3b   : > { %v1373_v8 = vld [vmem:[%s1936_s16] sm:$0xff]  ;;  %v1374_v10 = vld [vmem:[%s1936_s16 + $0x8] sm:$0xff]  ;;  %v1383_v13 = vld [vmem:[%s1936_s16 + $0x50] sm:$0xff]  ;;  %s1118_s14 = sshll.u32 %s1115_s20, 4  ;;  %s1104_s15 = scalar_lea.sflag [#allocation4], %s1930_s12  ;;  %s1119_s14 = int_to_ptr.hbm [resolvable:$true] %s1118_s14 }
  0x3c   : > { %v1381_v9 = vld [vmem:[%s1936_s16 + $0x40] sm:$0xff]  ;;  %v1382_v11 = vld [vmem:[%s1936_s16 + $0x48] sm:$0xff]  ;;  %v1376_v14 = vld [vmem:[%s1936_s16 + $0x18] sm:$0xff] }
  0x3d   : > { %520 = vmatpush.bf16.msra.mxu0 %v1395_v1  ;;  %1502 = vmatpush.bf16.msra.mxu2 %v1395_v1  ;;  %v1384_v15 = vld [vmem:[%s1936_s16 + $0x58] sm:$0xff]  ;;  %v1377_v16 = vld [vmem:[%s1936_s16 + $0x20] sm:$0xff]  ;;  %v1378_v19 = vld [vmem:[%s1936_s16 + $0x28] sm:$0xff] }
  0x3e   : > { %v1385_v17 = vld [vmem:[%s1936_s16 + $0x60] sm:$0xff]  ;;  %v1404_v18 = vld [vmem:[#allocation8 + $0x38] sm:$0xff]  ;;  %v1386_v20 = vld [vmem:[%s1936_s16 + $0x68] sm:$0xff]  ;;  %v1972_v35 = vstv %s321_s27 }
  0x3f   : > { %789 = vmatpush.bf16.msra.mxu1 %v1404_v18  ;;  %1509 = vmatpush.bf16.msra.mxu3 %v1404_v18  ;;  %v1403_v21 = vld [vmem:[#allocation8 + $0x30] sm:$0xff]  ;;  %v1402_v22 = vld [vmem:[#allocation8 + $0x28] sm:$0xff]  ;;  %v1401_v23 = vld [vmem:[#allocation8 + $0x20] sm:$0xff] }
  0x40   : > { %v1379_v24 = vld [vmem:[%s1936_s16 + $0x30] sm:$0xff]  ;;  %v1400_v26 = vld [vmem:[#allocation8 + $0x18] sm:$0xff]  ;;  %v1398_v28 = vld [vmem:[#allocation8 + $0x8] sm:$0xff] }
  0x41   : > { %521 = vmatpush.bf16.msra.mxu0 %v1394_v2  ;;  %1503 = vmatpush.bf16.msra.mxu2 %v1394_v2  ;;  %v1387_v25 = vld [vmem:[%s1936_s16 + $0x70] sm:$0xff]  ;;  %v1397_v29 = vld [vmem:[#allocation8] sm:$0xff]  ;;  %v1380_v30 = vld [vmem:[%s1936_s16 + $0x38] sm:$0xff] }
  0x42   : > { %v1399_v27 = vld [vmem:[#allocation8 + $0x10] sm:$0xff]  ;;  %v1388_v31 = vld [vmem:[%s1936_s16 + $0x78] sm:$0xff]  ;;  %v1969_v33 = vld [vmem:[%s2179_s2] ss:$0 sm:$0xff] }
  0x43   : > { %790 = vmatpush.bf16.msra.mxu1 %v1403_v21  ;;  %1510 = vmatpush.bf16.msra.mxu3 %v1403_v21 }
  0x45   : > { %522 = vmatpush.bf16.msra.mxu0 %v1393_v3  ;;  %1504 = vmatpush.bf16.msra.mxu2 %v1393_v3 }
  0x47   : > { %791 = vmatpush.bf16.msra.mxu1 %v1402_v22  ;;  %1511 = vmatpush.bf16.msra.mxu3 %v1402_v22 }
  0x49   : > { %523 = vmatpush.bf16.msra.mxu0 %v1392_v4  ;;  %1505 = vmatpush.bf16.msra.mxu2 %v1392_v4 }
  0x4b   : > { %792 = vmatpush.bf16.msra.mxu1 %v1401_v23  ;;  %1512 = vmatpush.bf16.msra.mxu3 %v1401_v23 }
  0x4d   : > { %524 = vmatpush.bf16.msra.mxu0 %v1391_v5  ;;  %1506 = vmatpush.bf16.msra.mxu2 %v1391_v5 }
  0x4f   : > { %793 = vmatpush.bf16.msra.mxu1 %v1400_v26  ;;  %1513 = vmatpush.bf16.msra.mxu3 %v1400_v26 }
  0x51   : > { %525 = vmatpush.bf16.msra.mxu0 %v1390_v6  ;;  %1507 = vmatpush.bf16.msra.mxu2 %v1390_v6 }
  0x53   : > { %794 = vmatpush.bf16.msra.mxu1 %v1399_v27  ;;  %1514 = vmatpush.bf16.msra.mxu3 %v1399_v27 }
  0x55   : > { %526 = vmatpush.bf16.msra.mxu0 %v1389_v7  ;;  %1508 = vmatpush.bf16.msra.mxu2 %v1389_v7 }
  0x57   : > { %795 = vmatpush.bf16.msra.mxu1 %v1398_v28  ;;  %1515 = vmatpush.bf16.msra.mxu3 %v1398_v28 }
  0x58   : > { %527 = vmatmul.bf16.vlgmr.msra.gmra.mxu0 %v1373_v8  ;;  %567 = vmatmul.bf16.vlgmr.msra.gmra.mxu2 %v1381_v9 }
  0x5b   : > { %796 = vmatpush.bf16.msra.mxu1 %v1397_v29  ;;  %1516 = vmatpush.bf16.msra.mxu3 %v1397_v29 }
  0x68   : > { %532 = vmatmul.bf16.gmra.mxu0 %v1374_v10  ;;  %572 = vmatmul.bf16.gmra.mxu2 %v1382_v11 }
  0x78   : > { %537 = vmatmul.bf16.gmra.mxu0 %v1375_v12  ;;  %577 = vmatmul.bf16.gmra.mxu2 %v1383_v13 }
  0x88   : > { %542 = vmatmul.bf16.gmra.mxu0 %v1376_v14  ;;  %582 = vmatmul.bf16.gmra.mxu2 %v1384_v15 }
  0x98   : > { %547 = vmatmul.bf16.gmra.mxu0 %v1377_v16  ;;  %587 = vmatmul.bf16.gmra.mxu2 %v1385_v17 }
  0xa8   : > { %552 = vmatmul.bf16.gmra.mxu0 %v1378_v19  ;;  %592 = vmatmul.bf16.gmra.mxu2 %v1386_v20 }
  0xb8   : > { %557 = vmatmul.bf16.gmra.mxu0 %v1379_v24  ;;  %597 = vmatmul.bf16.gmra.mxu2 %v1387_v25 }
  0xc8   : > { %562 = vmatmul.bf16.gmra.mxu0 %v1380_v30  ;;  %602 = vmatmul.bf16.gmra.mxu2 %v1388_v31 }
  0xd5   : > { %v528_v32 = vpop.f32.mrf.mxu0 }
  0xd6   : > { %v529_v34 = vadd.f32 %v1969_v33, %v528_v32 }
  0xd8   : > { %v641_v37 = vmul.f32 %v1972_v35, %v529_v34  ;;  %vm608_vm0 = vcmp.gt.f32.partialorder %v529_v34, 0.0 }
  0xda   : > { %v673_v42 = vsel %vm608_vm0, %v529_v34, %v641_v37 }
  0xdb   : > { %v568_v36 = vpop.f32.mrf.mxu2 }
  0xdc   : > { %v569_v40 = vadd.f32 %v1969_v33, %v568_v36 }
  0xdd   : > { %v530_v38 = vpop.f32.mrf.mxu0 }
  0xde   : > { %v531_v39 = vadd.f32 %v1969_v33, %v530_v38  ;;  %v657_v46 = vmul.f32 %v1972_v35, %v569_v40  ;;  %vm624_vm2 = vcmp.gt.f32.partialorder %v569_v40, 0.0 }
  0xe0   : > { %v642_v41 = vmul.f32 %v1972_v35, %v531_v39  ;;  %vm609_vm1 = vcmp.gt.f32.partialorder %v531_v39, 0.0  ;;  %v689_v51 = vsel %vm624_vm2, %v569_v40, %v657_v46 }
  0xe2   : > { %v674_v43 = vsel %vm609_vm1, %v531_v39, %v642_v41 }
  0xe3   : > { %v570_v44 = vpop.f32.mrf.mxu2  ;;  %v705_v45 = vpack.c.bf16 %v674_v43, %v673_v42 }
  0xe4   : > { %v571_v47 = vadd.f32 %v1969_v33, %v570_v44 }
  0xe5   : > { %v533_v48 = vpop.f32.mrf.mxu0  ;;  %797 = vmatmul.bf16.vlgmr.msra.gmra.mxu1 %v705_v45 }
  0xe6   : > { %v658_v49 = vmul.f32 %v1972_v35, %v571_v47  ;;  %vm625_vm3 = vcmp.gt.f32.partialorder %v571_v47, 0.0  ;;  %v534_v50 = vadd.f32 %v1969_v33, %v533_v48 }
  0xe8   : > { %v690_v52 = vsel %vm625_vm3, %v571_v47, %v658_v49  ;;  %v643_v55 = vmul.f32 %v1972_v35, %v534_v50  ;;  %vm610_vm4 = vcmp.gt.f32.partialorder %v534_v50, 0.0 }
  0xe9   : > { %v713_v53 = vpack.c.bf16 %v690_v52, %v689_v51 }
  0xea   : > { %v675_v60 = vsel %vm610_vm4, %v534_v50, %v643_v55 }
  0xeb   : > { %v573_v54 = vpop.f32.mrf.mxu2  ;;  %837 = vmatmul.bf16.vlgmr.msra.gmra.mxu3 %v713_v53 }
  0xec   : > { %v574_v58 = vadd.f32 %v1969_v33, %v573_v54 }
  0xed   : > { %v535_v56 = vpop.f32.mrf.mxu0 }
  0xee   : > { %v536_v57 = vadd.f32 %v1969_v33, %v535_v56  ;;  %v659_v0 = vmul.f32 %v1972_v35, %v574_v58  ;;  %vm626_vm6 = vcmp.gt.f32.partialorder %v574_v58, 0.0 }
  0xf0   : > { %v644_v59 = vmul.f32 %v1972_v35, %v536_v57  ;;  %vm611_vm5 = vcmp.gt.f32.partialorder %v536_v57, 0.0  ;;  %v691_v5 = vsel %vm626_vm6, %v574_v58, %v659_v0 }
  0xf2   : > { %v676_v61 = vsel %vm611_vm5, %v536_v57, %v644_v59 }
  0xf3   : > { %v575_v62 = vpop.f32.mrf.mxu2  ;;  %v706_v63 = vpack.c.bf16 %v676_v61, %v675_v60 }
  0xf4   : > { %v576_v1 = vadd.f32 %v1969_v33, %v575_v62 }
  0xf5   : > { %v538_v2 = vpop.f32.mrf.mxu0  ;;  %802 = vmatmul.bf16.gmra.mxu1 %v706_v63 }
  0xf6   : > { %v660_v3 = vmul.f32 %v1972_v35, %v576_v1  ;;  %vm627_vm7 = vcmp.gt.f32.partialorder %v576_v1, 0.0  ;;  %v539_v4 = vadd.f32 %v1969_v33, %v538_v2 }
  0xf8   : > { %v692_v6 = vsel %vm627_vm7, %v576_v1, %v660_v3  ;;  %v645_v9 = vmul.f32 %v1972_v35, %v539_v4  ;;  %vm612_vm8 = vcmp.gt.f32.partialorder %v539_v4, 0.0 }
  0xf9   : > { %v714_v7 = vpack.c.bf16 %v692_v6, %v691_v5 }
  0xfa   : > { %v677_v14 = vsel %vm612_vm8, %v539_v4, %v645_v9 }
  0xfb   : > { %v578_v8 = vpop.f32.mrf.mxu2  ;;  %842 = vmatmul.bf16.gmra.mxu3 %v714_v7 }
  0xfc   : > { %v579_v12 = vadd.f32 %v1969_v33, %v578_v8 }
  0xfd   : > { %v540_v10 = vpop.f32.mrf.mxu0 }
  0xfe   : > { %v541_v11 = vadd.f32 %v1969_v33, %v540_v10  ;;  %v661_v18 = vmul.f32 %v1972_v35, %v579_v12  ;;  %vm628_vm10 = vcmp.gt.f32.partialorder %v579_v12, 0.0 }
 0x100   : > { %v646_v13 = vmul.f32 %v1972_v35, %v541_v11  ;;  %vm613_vm9 = vcmp.gt.f32.partialorder %v541_v11, 0.0  ;;  %v693_v23 = vsel %vm628_vm10, %v579_v12, %v661_v18 }
 0x102   : > { %v678_v15 = vsel %vm613_vm9, %v541_v11, %v646_v13 }
 0x103   : > { %v580_v16 = vpop.f32.mrf.mxu2  ;;  %v707_v17 = vpack.c.bf16 %v678_v15, %v677_v14 }
 0x104   : > { %v581_v19 = vadd.f32 %v1969_v33, %v580_v16 }
 0x105   : > { %v543_v20 = vpop.f32.mrf.mxu0  ;;  %807 = vmatmul.bf16.gmra.mxu1 %v707_v17 }
 0x106   : > { %v662_v21 = vmul.f32 %v1972_v35, %v581_v19  ;;  %vm629_vm11 = vcmp.gt.f32.partialorder %v581_v19, 0.0  ;;  %v544_v22 = vadd.f32 %v1969_v33, %v543_v20 }
 0x108   : > { %v694_v24 = vsel %vm629_vm11, %v581_v19, %v662_v21  ;;  %v647_v27 = vmul.f32 %v1972_v35, %v544_v22  ;;  %vm614_vm12 = vcmp.gt.f32.partialorder %v544_v22, 0.0 }
 0x109   : > { %v715_v25 = vpack.c.bf16 %v694_v24, %v693_v23 }
 0x10a   : > { %v679_v32 = vsel %vm614_vm12, %v544_v22, %v647_v27 }
 0x10b   : > { %v583_v26 = vpop.f32.mrf.mxu2  ;;  %847 = vmatmul.bf16.gmra.mxu3 %v715_v25 }
 0x10c   : > { %v584_v30 = vadd.f32 %v1969_v33, %v583_v26 }
 0x10d   : > { %v545_v28 = vpop.f32.mrf.mxu0 }
 0x10e   : > { %v546_v29 = vadd.f32 %v1969_v33, %v545_v28  ;;  %v663_v38 = vmul.f32 %v1972_v35, %v584_v30  ;;  %vm630_vm14 = vcmp.gt.f32.partialorder %v584_v30, 0.0 }
 0x110   : > { %v648_v31 = vmul.f32 %v1972_v35, %v546_v29  ;;  %vm615_vm13 = vcmp.gt.f32.partialorder %v546_v29, 0.0  ;;  %v695_v43 = vsel %vm630_vm14, %v584_v30, %v663_v38 }
 0x112   : > { %v680_v34 = vsel %vm615_vm13, %v546_v29, %v648_v31 }
 0x113   : > { %v585_v36 = vpop.f32.mrf.mxu2  ;;  %v708_v37 = vpack.c.bf16 %v680_v34, %v679_v32 }
 0x114   : > { %v586_v39 = vadd.f32 %v1969_v33, %v585_v36 }
 0x115   : > { %v548_v40 = vpop.f32.mrf.mxu0  ;;  %812 = vmatmul.bf16.gmra.mxu1 %v708_v37 }
 0x116   : > { %v664_v41 = vmul.f32 %v1972_v35, %v586_v39  ;;  %vm631_vm15 = vcmp.gt.f32.partialorder %v586_v39, 0.0  ;;  %v549_v42 = vadd.f32 %v1969_v33, %v548_v40 }
 0x118   : > { %v696_v44 = vsel %vm631_vm15, %v586_v39, %v664_v41  ;;  %v649_v47 = vmul.f32 %v1972_v35, %v549_v42  ;;  %vm616_vm0 = vcmp.gt.f32.partialorder %v549_v42, 0.0 }
 0x119   : > { %v716_v45 = vpack.c.bf16 %v696_v44, %v695_v43 }
 0x11a   : > { %v681_v52 = vsel %vm616_vm0, %v549_v42, %v649_v47 }
 0x11b   : > { %v588_v46 = vpop.f32.mrf.mxu2  ;;  %852 = vmatmul.bf16.gmra.mxu3 %v716_v45 }
 0x11c   : > { %v589_v50 = vadd.f32 %v1969_v33, %v588_v46 }
 0x11d   : > { %v550_v48 = vpop.f32.mrf.mxu0 }
 0x11e   : > { %v551_v49 = vadd.f32 %v1969_v33, %v550_v48  ;;  %v665_v56 = vmul.f32 %v1972_v35, %v589_v50  ;;  %vm632_vm2 = vcmp.gt.f32.partialorder %v589_v50, 0.0 }
 0x120   : > { %v650_v51 = vmul.f32 %v1972_v35, %v551_v49  ;;  %vm617_vm1 = vcmp.gt.f32.partialorder %v551_v49, 0.0  ;;  %v697_v61 = vsel %vm632_vm2, %v589_v50, %v665_v56 }
 0x122   : > { %v682_v53 = vsel %vm617_vm1, %v551_v49, %v650_v51 }
 0x123   : > { %v590_v54 = vpop.f32.mrf.mxu2  ;;  %v709_v55 = vpack.c.bf16 %v682_v53, %v681_v52 }
 0x124   : > { %v591_v57 = vadd.f32 %v1969_v33, %v590_v54  ;;  %v2040_v54 = vld [vmem:[%s2181_s4] ss:$0 sm:$0xff] }
 0x125   : > { %v553_v58 = vpop.f32.mrf.mxu0  ;;  %817 = vmatmul.bf16.gmra.mxu1 %v709_v55 }
 0x126   : > { %v666_v59 = vmul.f32 %v1972_v35, %v591_v57  ;;  %vm633_vm3 = vcmp.gt.f32.partialorder %v591_v57, 0.0  ;;  %v554_v60 = vadd.f32 %v1969_v33, %v553_v58 }
 0x128   : > { %v698_v62 = vsel %vm633_vm3, %v591_v57, %v666_v59  ;;  %v651_v1 = vmul.f32 %v1972_v35, %v554_v60  ;;  %vm618_vm4 = vcmp.gt.f32.partialorder %v554_v60, 0.0  ;;  %v2043_v57 = vstv %s1238_s26  ;;  %s1725_s26 = scalar_lea.hbm %s2183_s6, 512 }
 0x129   : > { %v717_v63 = vpack.c.bf16 %v698_v62, %v697_v61 }
 0x12a   : > { %v683_v6 = vsel %vm618_vm4, %v554_v60, %v651_v1 }
 0x12b   : > { %v593_v0 = vpop.f32.mrf.mxu2  ;;  %857 = vmatmul.bf16.gmra.mxu3 %v717_v63 }
 0x12c   : > { %v594_v4 = vadd.f32 %v1969_v33, %v593_v0 }
 0x12d   : > { %v555_v2 = vpop.f32.mrf.mxu0 }
 0x12e   : > { %v556_v3 = vadd.f32 %v1969_v33, %v555_v2  ;;  %v667_v10 = vmul.f32 %v1972_v35, %v594_v4  ;;  %vm634_vm6 = vcmp.gt.f32.partialorder %v594_v4, 0.0 }
 0x130   : > { %v652_v5 = vmul.f32 %v1972_v35, %v556_v3  ;;  %vm619_vm5 = vcmp.gt.f32.partialorder %v556_v3, 0.0  ;;  %v699_v15 = vsel %vm634_vm6, %v594_v4, %v667_v10 }
 0x132   : > { %v684_v7 = vsel %vm619_vm5, %v556_v3, %v652_v5 }
 0x133   : > { %v595_v8 = vpop.f32.mrf.mxu2  ;;  %v710_v9 = vpack.c.bf16 %v684_v7, %v683_v6  ;;  %v339_v7 = vld [vmem:[%s1936_s16 + $0x40] sm:$0xff]  }
 0x134   : > { %v596_v11 = vadd.f32 %v1969_v33, %v595_v8 }
 0x135   : > { %v558_v12 = vpop.f32.mrf.mxu0  ;;  %822 = vmatmul.bf16.gmra.mxu1 %v710_v9 }
 0x136   : > { %v668_v13 = vmul.f32 %v1972_v35, %v596_v11  ;;  %vm635_vm7 = vcmp.gt.f32.partialorder %v596_v11, 0.0  ;;  %v559_v14 = vadd.f32 %v1969_v33, %v558_v12  ;;  %v991_v12 = vunpack.c.l.bf16 %v339_v7 }
 0x138   : > { %v700_v16 = vsel %vm635_vm7, %v596_v11, %v668_v13  ;;  %v653_v19 = vmul.f32 %v1972_v35, %v559_v14  ;;  %vm620_vm8 = vcmp.gt.f32.partialorder %v559_v14, 0.0  ;;  %v992_v13 = vunpack.c.h.bf16 %v339_v7 }
 0x139   : > { %v718_v17 = vpack.c.bf16 %v700_v16, %v699_v15  ;;  %v325_v15 = vld [vmem:[%s1936_s16 + $0x8] sm:$0xff]  }
 0x13a   : > { %v685_v24 = vsel %vm620_vm8, %v559_v14, %v653_v19 }
 0x13b   : > { %v598_v18 = vpop.f32.mrf.mxu2  ;;  %862 = vmatmul.bf16.gmra.mxu3 %v718_v17 }
 0x13c   : > { %v599_v22 = vadd.f32 %v1969_v33, %v598_v18 }
 0x13d   : > { %v560_v20 = vpop.f32.mrf.mxu0 }
 0x13e   : > { %v561_v21 = vadd.f32 %v1969_v33, %v560_v20  ;;  %v669_v28 = vmul.f32 %v1972_v35, %v599_v22  ;;  %vm636_vm10 = vcmp.gt.f32.partialorder %v599_v22, 0.0 }
 0x140   : > { %v654_v23 = vmul.f32 %v1972_v35, %v561_v21  ;;  %vm621_vm9 = vcmp.gt.f32.partialorder %v561_v21, 0.0  ;;  %v701_v34 = vsel %vm636_vm10, %v599_v22, %v669_v28  ;;  %v977_v22 = vunpack.c.l.bf16 %v325_v15 }
 0x142   : > { %v686_v25 = vsel %vm621_vm9, %v561_v21, %v654_v23 }
 0x143   : > { %v600_v26 = vpop.f32.mrf.mxu2  ;;  %v711_v27 = vpack.c.bf16 %v686_v25, %v685_v24  ;;  %v978_v24 = vunpack.c.h.bf16 %v325_v15 }
 0x144   : > { %v601_v29 = vadd.f32 %v1969_v33, %v600_v26 }
 0x145   : > { %v563_v30 = vpop.f32.mrf.mxu0  ;;  %827 = vmatmul.bf16.gmra.mxu1 %v711_v27 }
 0x146   : > { %v670_v31 = vmul.f32 %v1972_v35, %v601_v29  ;;  %vm637_vm11 = vcmp.gt.f32.partialorder %v601_v29, 0.0  ;;  %v564_v32 = vadd.f32 %v1969_v33, %v563_v30 }
 0x148   : > { %v702_v36 = vsel %vm637_vm11, %v601_v29, %v670_v31  ;;  %v655_v39 = vmul.f32 %v1972_v35, %v564_v32  ;;  %vm622_vm12 = vcmp.gt.f32.partialorder %v564_v32, 0.0 }
 0x149   : > { %v719_v37 = vpack.c.bf16 %v702_v36, %v701_v34 }
 0x14a   : > { %v687_v44 = vsel %vm622_vm12, %v564_v32, %v655_v39 }
 0x14b   : > { %v603_v38 = vpop.f32.mrf.mxu2  ;;  %867 = vmatmul.bf16.gmra.mxu3 %v719_v37  ;;  %v341_v37 = vld [vmem:[%s1936_s16 + $0x48] sm:$0xff]  }
 0x14c   : > { %v604_v42 = vadd.f32 %v1969_v33, %v603_v38 }
 0x14d   : > { %v565_v40 = vpop.f32.mrf.mxu0 }
 0x14e   : > { %v566_v41 = vadd.f32 %v1969_v33, %v565_v40  ;;  %v671_v48 = vmul.f32 %v1972_v35, %v604_v42  ;;  %vm638_vm14 = vcmp.gt.f32.partialorder %v604_v42, 0.0 }
 0x150   : > { %v656_v43 = vmul.f32 %v1972_v35, %v566_v41  ;;  %vm623_vm13 = vcmp.gt.f32.partialorder %v566_v41, 0.0  ;;  %v703_v51 = vsel %vm638_vm14, %v604_v42, %v671_v48  ;;  %v993_v42 = vunpack.c.l.bf16 %v341_v37 }
 0x152   : > { %v688_v45 = vsel %vm623_vm13, %v566_v41, %v656_v43  ;;  %v994_v43 = vunpack.c.h.bf16 %v341_v37 }
 0x153   : > { %v605_v46 = vpop.f32.mrf.mxu2  ;;  %v712_v47 = vpack.c.bf16 %v688_v45, %v687_v44  ;;  %v327_v45 = vld [vmem:[%s1936_s16 + $0x10] sm:$0xff]  }
 0x154   : > { %v606_v49 = vadd.f32 %v1969_v33, %v605_v46  ;;  %v323_v33 = vld [vmem:[%s1936_s16] sm:$0xff]  }
 0x155   : > { %832 = vmatmul.bf16.gmra.mxu1 %v712_v47  ;;  %v975_v60 = vunpack.c.l.bf16 %v323_v33  ;;  %v976_v61 = vunpack.c.h.bf16 %v323_v33 }
 0x156   : > { %v672_v50 = vmul.f32 %v1972_v35, %v606_v49  ;;  %vm639_vm15 = vcmp.gt.f32.partialorder %v606_v49, 0.0 }
 0x158   : > { %v704_v52 = vsel %vm639_vm15, %v606_v49, %v672_v50 }
 0x159   : > { %v720_v53 = vpack.c.bf16 %v704_v52, %v703_v51  ;;  %v979_v52 = vunpack.c.l.bf16 %v327_v45 }
 0x15b   : > { %872 = vmatmul.bf16.gmra.mxu3 %v720_v53 }
 0x162   : > { %v798_v55 = vpop.f32.mrf.mxu1 }
 0x163   : > { %v799_v56 = vadd.f32 %v2040_v54, %v798_v55  ;;  %v980_v55 = vunpack.c.h.bf16 %v327_v45 }
 0x165   : > { %v911_v58 = vmul.f32 %v2043_v57, %v799_v56  ;;  %vm878_vm0 = vcmp.gt.f32.partialorder %v799_v56, 0.0 }
 0x167   : > { %v943_v62 = vsel %vm878_vm0, %v799_v56, %v911_v58 }
 0x168   : > { %v1007_v2 = vadd.f32 %v975_v60, %v943_v62 }
 0x16a   : > { %v800_v35 = vpop.f32.mrf.mxu1 }
 0x16b   : > { %v801_v59 = vadd.f32 %v2040_v54, %v800_v35 }
 0x16d   : > { %vm879_vm1 = vcmp.gt.f32.partialorder %v801_v59, 0.0  ;;  %v912_v63 = vmul.f32 %v2043_v57, %v801_v59 }
 0x16e   : > { %v838_v0 = vpop.f32.mrf.mxu3 }
 0x16f   : > { %v944_v1 = vsel %vm879_vm1, %v801_v59, %v912_v63  ;;  %v839_v4 = vadd.f32 %v2040_v54, %v838_v0 }
 0x170   : > { %v1008_v3 = vadd.f32 %v976_v61, %v944_v1  ;;  %v343_v1 = vld [vmem:[%s1936_s16 + $0x50] sm:$0xff]  }
 0x171   : > { %v927_v8 = vmul.f32 %v2043_v57, %v839_v4  ;;  %vm894_vm2 = vcmp.gt.f32.partialorder %v839_v4, 0.0  ;;  %v996_v7 = vunpack.c.h.bf16 %v343_v1 }
 0x172   : > { %v1409_v5 = vpack.c.bf16 %v1008_v3, %v1007_v2  ;;  %v803_v6 = vpop.f32.mrf.mxu1 }
 0x173   : > { %v804_v9 = vadd.f32 %v2040_v54, %v803_v6  ;;  %v959_v14 = vsel %vm894_vm2, %v839_v4, %v927_v8  ;;  %v995_v6 = vunpack.c.l.bf16 %v343_v1 }
 0x174   : > { %1410 = vst [vmem:[%s2052_s13] sm:$0xff] %v1409_v5   ;;  %v1023_v21 = vadd.f32 %v991_v12, %v959_v14 }
 0x175   : > { %v913_v16 = vmul.f32 %v2043_v57, %v804_v9  ;;  %vm880_vm4 = vcmp.gt.f32.partialorder %v804_v9, 0.0 }
 0x176   : > { %v840_v10 = vpop.f32.mrf.mxu3 }
 0x177   : > { %v841_v11 = vadd.f32 %v2040_v54, %v840_v10  ;;  %v945_v25 = vsel %vm880_vm4, %v804_v9, %v913_v16  ;;  %v329_v9 = vld [vmem:[%s1936_s16 + $0x18] sm:$0xff]  }
 0x178   : > { %v1009_v30 = vadd.f32 %v977_v22, %v945_v25  ;;  %v981_v16 = vunpack.c.l.bf16 %v329_v9 }
 0x179   : > { %vm895_vm3 = vcmp.gt.f32.partialorder %v841_v11, 0.0  ;;  %v928_v17 = vmul.f32 %v2043_v57, %v841_v11 }
 0x17a   : > { %v805_v18 = vpop.f32.mrf.mxu1 }
 0x17b   : > { %v960_v19 = vsel %vm895_vm3, %v841_v11, %v928_v17  ;;  %v806_v20 = vadd.f32 %v2040_v54, %v805_v18  ;;  %v982_v18 = vunpack.c.h.bf16 %v329_v9 }
 0x17c   : > { %v1024_v23 = vadd.f32 %v992_v13, %v960_v19 }
 0x17d   : > { %vm881_vm5 = vcmp.gt.f32.partialorder %v806_v20, 0.0  ;;  %v914_v26 = vmul.f32 %v2043_v57, %v806_v20 }
 0x17e   : > { %v1449_v27 = vpack.c.bf16 %v1024_v23, %v1023_v21  ;;  %v843_v28 = vpop.f32.mrf.mxu3 }
 0x17f   : > { %v946_v29 = vsel %vm881_vm5, %v806_v20, %v914_v26  ;;  %v844_v32 = vadd.f32 %v2040_v54, %v843_v28 }
 0x180   : > { %1493 = vst [vmem:[%s2052_s13 + $0x40] sm:$0xff] %v1449_v27   ;;  %v1010_v31 = vadd.f32 %v978_v24, %v946_v29  ;;  %v345_v29 = vld [vmem:[%s1936_s16 + $0x58] sm:$0xff]  }
 0x181   : > { %v929_v38 = vmul.f32 %v2043_v57, %v844_v32  ;;  %vm896_vm6 = vcmp.gt.f32.partialorder %v844_v32, 0.0  ;;  %v998_v37 = vunpack.c.h.bf16 %v345_v29 }
 0x182   : > { %v1414_v34 = vpack.c.bf16 %v1010_v31, %v1009_v30  ;;  %v808_v36 = vpop.f32.mrf.mxu1 }
 0x183   : > { %v809_v39 = vadd.f32 %v2040_v54, %v808_v36  ;;  %v961_v44 = vsel %vm896_vm6, %v844_v32, %v929_v38  ;;  %v997_v36 = vunpack.c.l.bf16 %v345_v29 }
 0x184   : > { %1486 = vst [vmem:[%s2052_s13 + $0x8] sm:$0xff] %v1414_v34   ;;  %v1025_v51 = vadd.f32 %v993_v42, %v961_v44 }
 0x185   : > { %v915_v46 = vmul.f32 %v2043_v57, %v809_v39  ;;  %vm882_vm8 = vcmp.gt.f32.partialorder %v809_v39, 0.0 }
 0x186   : > { %v845_v40 = vpop.f32.mrf.mxu3 }
 0x187   : > { %v846_v41 = vadd.f32 %v2040_v54, %v845_v40  ;;  %v947_v56 = vsel %vm882_vm8, %v809_v39, %v915_v46  ;;  %v331_v39 = vld [vmem:[%s1936_s16 + $0x20] sm:$0xff]  }
 0x188   : > { %v1011_v60 = vadd.f32 %v979_v52, %v947_v56  ;;  %v983_v46 = vunpack.c.l.bf16 %v331_v39 }
 0x189   : > { %vm897_vm7 = vcmp.gt.f32.partialorder %v846_v41, 0.0  ;;  %v930_v47 = vmul.f32 %v2043_v57, %v846_v41 }
 0x18a   : > { %v810_v48 = vpop.f32.mrf.mxu1 }
 0x18b   : > { %v962_v49 = vsel %vm897_vm7, %v846_v41, %v930_v47  ;;  %v811_v50 = vadd.f32 %v2040_v54, %v810_v48  ;;  %v984_v48 = vunpack.c.h.bf16 %v331_v39 }
 0x18c   : > { %v1026_v53 = vadd.f32 %v994_v43, %v962_v49 }
 0x18d   : > { %vm883_vm9 = vcmp.gt.f32.partialorder %v811_v50, 0.0  ;;  %v916_v33 = vmul.f32 %v2043_v57, %v811_v50 }
 0x18e   : > { %v1454_v58 = vpack.c.bf16 %v1026_v53, %v1025_v51  ;;  %v848_v35 = vpop.f32.mrf.mxu3 }
 0x18f   : > { %v948_v59 = vsel %vm883_vm9, %v811_v50, %v916_v33  ;;  %v849_v62 = vadd.f32 %v2040_v54, %v848_v35 }
 0x190   : > { %1494 = vst [vmem:[%s2052_s13 + $0x48] sm:$0xff] %v1454_v58   ;;  %v1012_v61 = vadd.f32 %v980_v55, %v948_v59  ;;  %v347_v59 = vld [vmem:[%s1936_s16 + $0x60] sm:$0xff]  }
 0x191   : > { %v931_v2 = vmul.f32 %v2043_v57, %v849_v62  ;;  %vm898_vm10 = vcmp.gt.f32.partialorder %v849_v62, 0.0  ;;  %v1000_v1 = vunpack.c.h.bf16 %v347_v59 }
 0x192   : > { %v1419_v63 = vpack.c.bf16 %v1012_v61, %v1011_v60  ;;  %v813_v0 = vpop.f32.mrf.mxu1 }
 0x193   : > { %v814_v3 = vadd.f32 %v2040_v54, %v813_v0  ;;  %v963_v8 = vsel %vm898_vm10, %v849_v62, %v931_v2  ;;  %v999_v0 = vunpack.c.l.bf16 %v347_v59 }
 0x194   : > { %1487 = vst [vmem:[%s2052_s13 + $0x10] sm:$0xff] %v1419_v63   ;;  %v1027_v15 = vadd.f32 %v995_v6, %v963_v8 }
 0x195   : > { %v917_v10 = vmul.f32 %v2043_v57, %v814_v3  ;;  %vm884_vm12 = vcmp.gt.f32.partialorder %v814_v3, 0.0 }
 0x196   : > { %v850_v4 = vpop.f32.mrf.mxu3 }
 0x197   : > { %v851_v5 = vadd.f32 %v2040_v54, %v850_v4  ;;  %v949_v19 = vsel %vm884_vm12, %v814_v3, %v917_v10  ;;  %v333_v3 = vld [vmem:[%s1936_s16 + $0x28] sm:$0xff]  }
 0x198   : > { %v1013_v24 = vadd.f32 %v981_v16, %v949_v19  ;;  %v985_v10 = vunpack.c.l.bf16 %v333_v3 }
 0x199   : > { %vm899_vm11 = vcmp.gt.f32.partialorder %v851_v5, 0.0  ;;  %v932_v11 = vmul.f32 %v2043_v57, %v851_v5 }
 0x19a   : > { %v815_v12 = vpop.f32.mrf.mxu1 }
 0x19b   : > { %v964_v13 = vsel %vm899_vm11, %v851_v5, %v932_v11  ;;  %v816_v14 = vadd.f32 %v2040_v54, %v815_v12  ;;  %v986_v12 = vunpack.c.h.bf16 %v333_v3 }
 0x19c   : > { %v1028_v17 = vadd.f32 %v996_v7, %v964_v13 }
 0x19d   : > { %vm885_vm13 = vcmp.gt.f32.partialorder %v816_v14, 0.0  ;;  %v918_v20 = vmul.f32 %v2043_v57, %v816_v14 }
 0x19e   : > { %v1459_v21 = vpack.c.bf16 %v1028_v17, %v1027_v15  ;;  %v853_v22 = vpop.f32.mrf.mxu3 }
 0x19f   : > { %v950_v23 = vsel %vm885_vm13, %v816_v14, %v918_v20  ;;  %v854_v26 = vadd.f32 %v2040_v54, %v853_v22 }
 0x1a0   : > { %1495 = vst [vmem:[%s2052_s13 + $0x50] sm:$0xff] %v1459_v21   ;;  %v1014_v25 = vadd.f32 %v982_v18, %v950_v23  ;;  %v349_v23 = vld [vmem:[%s1936_s16 + $0x68] sm:$0xff]  }
 0x1a1   : > { %v933_v30 = vmul.f32 %v2043_v57, %v854_v26  ;;  %vm900_vm14 = vcmp.gt.f32.partialorder %v854_v26, 0.0  ;;  %v1002_v29 = vunpack.c.h.bf16 %v349_v23 }
 0x1a2   : > { %v1424_v27 = vpack.c.bf16 %v1014_v25, %v1013_v24  ;;  %v818_v28 = vpop.f32.mrf.mxu1 }
 0x1a3   : > { %v819_v31 = vadd.f32 %v2040_v54, %v818_v28  ;;  %v965_v38 = vsel %vm900_vm14, %v854_v26, %v933_v30  ;;  %v1001_v28 = vunpack.c.l.bf16 %v349_v23 }
 0x1a4   : > { %1488 = vst [vmem:[%s2052_s13 + $0x18] sm:$0xff] %v1424_v27   ;;  %v1029_v45 = vadd.f32 %v997_v36, %v965_v38 }
 0x1a5   : > { %v919_v40 = vmul.f32 %v2043_v57, %v819_v31  ;;  %vm886_vm0 = vcmp.gt.f32.partialorder %v819_v31, 0.0 }
 0x1a6   : > { %v855_v32 = vpop.f32.mrf.mxu3 }
 0x1a7   : > { %v856_v34 = vadd.f32 %v2040_v54, %v855_v32  ;;  %v951_v49 = vsel %vm886_vm0, %v819_v31, %v919_v40  ;;  %v335_v31 = vld [vmem:[%s1936_s16 + $0x30] sm:$0xff]  }
 0x1a8   : > { %v1015_v55 = vadd.f32 %v983_v46, %v951_v49  ;;  %v987_v40 = vunpack.c.l.bf16 %v335_v31 }
 0x1a9   : > { %vm901_vm15 = vcmp.gt.f32.partialorder %v856_v34, 0.0  ;;  %v934_v41 = vmul.f32 %v2043_v57, %v856_v34 }
 0x1aa   : > { %v820_v42 = vpop.f32.mrf.mxu1 }
 0x1ab   : > { %v966_v43 = vsel %vm901_vm15, %v856_v34, %v934_v41  ;;  %v821_v44 = vadd.f32 %v2040_v54, %v820_v42  ;;  %v988_v42 = vunpack.c.h.bf16 %v335_v31 }
 0x1ac   : > { %v1030_v47 = vadd.f32 %v998_v37, %v966_v43 }
 0x1ad   : > { %vm887_vm1 = vcmp.gt.f32.partialorder %v821_v44, 0.0  ;;  %v920_v50 = vmul.f32 %v2043_v57, %v821_v44 }
 0x1ae   : > { %v1464_v51 = vpack.c.bf16 %v1030_v47, %v1029_v45  ;;  %v858_v52 = vpop.f32.mrf.mxu3 }
 0x1af   : > { %v952_v53 = vsel %vm887_vm1, %v821_v44, %v920_v50  ;;  %v859_v33 = vadd.f32 %v2040_v54, %v858_v52 }
 0x1b0   : > { %1496 = vst [vmem:[%s2052_s13 + $0x58] sm:$0xff] %v1464_v51   ;;  %v1016_v56 = vadd.f32 %v984_v48, %v952_v53  ;;  %v351_v53 = vld [vmem:[%s1936_s16 + $0x70] sm:$0xff]  }
 0x1b1   : > { %v935_v60 = vmul.f32 %v2043_v57, %v859_v33  ;;  %vm902_vm2 = vcmp.gt.f32.partialorder %v859_v33, 0.0  ;;  %v1004_v59 = vunpack.c.h.bf16 %v351_v53 }
 0x1b2   : > { %v1429_v58 = vpack.c.bf16 %v1016_v56, %v1015_v55  ;;  %v823_v35 = vpop.f32.mrf.mxu1 }
 0x1b3   : > { %v824_v61 = vadd.f32 %v2040_v54, %v823_v35  ;;  %v967_v2 = vsel %vm902_vm2, %v859_v33, %v935_v60  ;;  %v1003_v35 = vunpack.c.l.bf16 %v351_v53 }
 0x1b4   : > { %1489 = vst [vmem:[%s2052_s13 + $0x20] sm:$0xff] %v1429_v58   ;;  %v1031_v9 = vadd.f32 %v999_v0, %v967_v2 }
 0x1b5   : > { %v921_v4 = vmul.f32 %v2043_v57, %v824_v61  ;;  %vm888_vm4 = vcmp.gt.f32.partialorder %v824_v61, 0.0 }
 0x1b6   : > { %v860_v62 = vpop.f32.mrf.mxu3 }
 0x1b7   : > { %v861_v63 = vadd.f32 %v2040_v54, %v860_v62  ;;  %v953_v13 = vsel %vm888_vm4, %v824_v61, %v921_v4  ;;  %v337_v61 = vld [vmem:[%s1936_s16 + $0x38] sm:$0xff]  }
 0x1b8   : > { %v1017_v18 = vadd.f32 %v985_v10, %v953_v13  ;;  %v989_v4 = vunpack.c.l.bf16 %v337_v61 }
 0x1b9   : > { %vm903_vm3 = vcmp.gt.f32.partialorder %v861_v63, 0.0  ;;  %v936_v5 = vmul.f32 %v2043_v57, %v861_v63 }
 0x1ba   : > { %v825_v6 = vpop.f32.mrf.mxu1 }
 0x1bb   : > { %v968_v7 = vsel %vm903_vm3, %v861_v63, %v936_v5  ;;  %v826_v8 = vadd.f32 %v2040_v54, %v825_v6  ;;  %v990_v6 = vunpack.c.h.bf16 %v337_v61 }
 0x1bc   : > { %v1032_v11 = vadd.f32 %v1000_v1, %v968_v7 }
 0x1bd   : > { %vm889_vm5 = vcmp.gt.f32.partialorder %v826_v8, 0.0  ;;  %v922_v14 = vmul.f32 %v2043_v57, %v826_v8 }
 0x1be   : > { %v1469_v15 = vpack.c.bf16 %v1032_v11, %v1031_v9  ;;  %v863_v16 = vpop.f32.mrf.mxu3 }
 0x1bf   : > { %v954_v17 = vsel %vm889_vm5, %v826_v8, %v922_v14  ;;  %v864_v20 = vadd.f32 %v2040_v54, %v863_v16  ;;  %v353_v16 = vld [vmem:[%s1936_s16 + $0x78] sm:$0xff]   ;;  %s1719_s16 = sshra.s32 %s1119_s14, 4  ;;  %s1720_s16 = int_to_ptr.hbm [resolvable:$true] %s1719_s16 }
 0x1c0   : > { %1497 = vst [vmem:[%s2052_s13 + $0x60] sm:$0xff] %v1469_v15   ;;  %v1018_v19 = vadd.f32 %v986_v12, %v954_v17  ;;  %s1721_s27 = scalar_lea.hbm %s1720_s16, 128  ;;  %p1726_p7 = scmp.lt.s32.totalorder %s1720_s16, %s2183_s6 }
 0x1c1   : > { %v937_v24 = vmul.f32 %v2043_v57, %v864_v20  ;;  %vm904_vm6 = vcmp.gt.f32.partialorder %v864_v20, 0.0  ;;  %p1722_p1 = scmp.ne.s32.totalorder %s1720_s16, %s1721_s27  ;;  %p1727_p2 = scmp.lt.s32.totalorder %s1725_s26, %s1721_s27 }
 0x1c2   : > { %v1434_v21 = vpack.c.bf16 %v1018_v19, %v1017_v18  ;;  %v828_v22 = vpop.f32.mrf.mxu1 }
 0x1c3   : > { %v829_v25 = vadd.f32 %v2040_v54, %v828_v22  ;;  %v969_v30 = vsel %vm904_vm6, %v864_v20, %v937_v24  ;;  %v1005_v20 = vunpack.c.l.bf16 %v353_v16  ;;  %p1723_p4 = pnand %p1722_p1, %p1900_p0  ;;  %p1728_p9 = por %p1727_p2, %p1726_p7 }
 0x1c4   : > { %1490 = vst [vmem:[%s2052_s13 + $0x28] sm:$0xff] %v1434_v21   ;;  %v1033_v39 = vadd.f32 %v1001_v28, %v969_v30  ;;  %v1006_v21 = vunpack.c.h.bf16 %v353_v16 }
 0x1c5   : > { %v923_v32 = vmul.f32 %v2043_v57, %v829_v25  ;;  %vm890_vm8 = vcmp.gt.f32.partialorder %v829_v25, 0.0  ;;  %p1724_p8 = pneg %p1723_p4 }
 0x1c6   : > { %v865_v26 = vpop.f32.mrf.mxu3 }
 0x1c7   : > { %v866_v27 = vadd.f32 %v2040_v54, %v865_v26  ;;  %v955_v43 = vsel %vm890_vm8, %v829_v25, %v923_v32  ;;  %p1729_p10 = pnand %p1728_p9, %p1724_p8 }
 0x1c8   : > { %v1019_v48 = vadd.f32 %v987_v40, %v955_v43 }
 0x1c9   : > { %vm905_vm7 = vcmp.gt.f32.partialorder %v866_v27, 0.0  ;;  %v938_v34 = vmul.f32 %v2043_v57, %v866_v27 }
 0x1ca   : > { %v830_v36 = vpop.f32.mrf.mxu1 }
 0x1cb   : > { %v970_v37 = vsel %vm905_vm7, %v866_v27, %v938_v34  ;;  %v831_v38 = vadd.f32 %v2040_v54, %v830_v36 }
 0x1cc   : > { %v1034_v41 = vadd.f32 %v1002_v29, %v970_v37 }
 0x1cd   : > { %vm891_vm9 = vcmp.gt.f32.partialorder %v831_v38, 0.0  ;;  %v924_v44 = vmul.f32 %v2043_v57, %v831_v38 }
 0x1ce   : > { %v1474_v45 = vpack.c.bf16 %v1034_v41, %v1033_v39  ;;  %v868_v46 = vpop.f32.mrf.mxu3 }
 0x1cf   : > { %v956_v47 = vsel %vm891_vm9, %v831_v38, %v924_v44  ;;  %v869_v50 = vadd.f32 %v2040_v54, %v868_v46 }
 0x1d0   : > { %1498 = vst [vmem:[%s2052_s13 + $0x68] sm:$0xff] %v1474_v45   ;;  %v1020_v49 = vadd.f32 %v988_v42, %v956_v47 }
 0x1d1   : > { %v939_v55 = vmul.f32 %v2043_v57, %v869_v50  ;;  %vm906_vm10 = vcmp.gt.f32.partialorder %v869_v50, 0.0 }
 0x1d2   : > { %v1439_v51 = vpack.c.bf16 %v1020_v49, %v1019_v48  ;;  %v833_v52 = vpop.f32.mrf.mxu1 }
 0x1d3   : > { %v834_v56 = vadd.f32 %v2040_v54, %v833_v52  ;;  %v971_v60 = vsel %vm906_vm10, %v869_v50, %v939_v55 }
 0x1d4   : > { %1491 = vst [vmem:[%s2052_s13 + $0x30] sm:$0xff] %v1439_v51   ;;  %v1035_v3 = vadd.f32 %v1003_v35, %v971_v60 }
 0x1d5   : > { %v925_v62 = vmul.f32 %v2043_v57, %v834_v56  ;;  %vm892_vm12 = vcmp.gt.f32.partialorder %v834_v56, 0.0 }
 0x1d6   : > { %v870_v33 = vpop.f32.mrf.mxu3 }
 0x1d7   : > { %v871_v58 = vadd.f32 %v2040_v54, %v870_v33  ;;  %v957_v7 = vsel %vm892_vm12, %v834_v56, %v925_v62 }
 0x1d8   : > { %v1021_v12 = vadd.f32 %v989_v4, %v957_v7 }
 0x1d9   : > { %vm907_vm11 = vcmp.gt.f32.partialorder %v871_v58, 0.0  ;;  %v940_v63 = vmul.f32 %v2043_v57, %v871_v58 }
 0x1da   : > { %v835_v0 = vpop.f32.mrf.mxu1 }
 0x1db   : > { %v972_v1 = vsel %vm907_vm11, %v871_v58, %v940_v63  ;;  %v836_v2 = vadd.f32 %v2040_v54, %v835_v0 }
 0x1dc   : > { %v1036_v5 = vadd.f32 %v1004_v59, %v972_v1 }
 0x1dd   : > { %vm893_vm13 = vcmp.gt.f32.partialorder %v836_v2, 0.0  ;;  %v926_v8 = vmul.f32 %v2043_v57, %v836_v2 }
 0x1de   : > { %v1479_v9 = vpack.c.bf16 %v1036_v5, %v1035_v3  ;;  %v873_v10 = vpop.f32.mrf.mxu3 }
 0x1df   : > { %v958_v11 = vsel %vm893_vm13, %v836_v2, %v926_v8  ;;  %v874_v14 = vadd.f32 %v2040_v54, %v873_v10 }
 0x1e0   : > { %1499 = vst [vmem:[%s2052_s13 + $0x70] sm:$0xff] %v1479_v9   ;;  %v1022_v13 = vadd.f32 %v990_v6, %v958_v11 }
 0x1e1   : > { %v941_v17 = vmul.f32 %v2043_v57, %v874_v14  ;;  %vm908_vm14 = vcmp.gt.f32.partialorder %v874_v14, 0.0 }
 0x1e2   : > { %v1444_v15 = vpack.c.bf16 %v1022_v13, %v1021_v12 }
 0x1e3   : > { %v973_v22 = vsel %vm908_vm14, %v874_v14, %v941_v17 }
 0x1e4   : > { %1492 = vst [vmem:[%s2052_s13 + $0x38] sm:$0xff] %v1444_v15   ;;  %v1037_v25 = vadd.f32 %v1005_v20, %v973_v22 }
 0x1e6   : > { %v875_v18 = vpop.f32.mrf.mxu3 }
 0x1e7   : > { %v876_v19 = vadd.f32 %v2040_v54, %v875_v18 }
 0x1e9   : > { %vm909_vm15 = vcmp.gt.f32.partialorder %v876_v19, 0.0  ;;  %v942_v23 = vmul.f32 %v2043_v57, %v876_v19 }
 0x1eb   : > { %v974_v24 = vsel %vm909_vm15, %v876_v19, %v942_v23 }
 0x1ec   : > { %v1038_v26 = vadd.f32 %v1006_v21, %v974_v24 }
 0x1ee   : > { %v1484_v54 = vpack.c.bf16 %v1038_v26, %v1037_v25 }
 0x1f0   : > { %1500 = vst [vmem:[%s2052_s13 + $0x78] sm:$0xff] %v1484_v54  }
 0x1f1   : > { %1732 = shalt.err (!%p1729_p10)
}
 0x1f2   : > { %s1786_s12 = smov 64   ;;  %s1787_s13 = smov 4  }
 0x1f3   : > { %1531 = dma.vmem_to_hbm [thread:$0]  (%p1900_p0), %s1117_s25, 2048, %s1119_s14, %s1104_s15, %s1786_s12, %s1786_s12, %s1787_s13  }
 0x1f4 PF: > { %p1558_p11 = scmp.ge.s32.totalorder %s1779_s24, 2  ;;  %s1133_s17 = sand.u32 1, %s1767_s21  }
 0x1f5   : > { %s1134_s18 = scalar_lea.sflag [#allocation4], %s1133_s17 }
 0x1f6   : > { %p1548_p12 = pnand %p1558_p11, %p1858_p6 }
 0x1f8   : > { %p1549_p13 = pneg %p1548_p12 }
 0x1fa   : > { %1762 = dma.done.wait (%p1549_p13), %s1134_s18, 2048  }
 0x1fb   : > { %1764 = vsyncadd (%p1549_p13), %s1134_s18, 4294965248  ;;  %p21_p3 = scmp.ge.s32.totalorder %s1887_s29, 6   ;;  %s2193_s21 = smov %s1771_s22 }
 0x1fc   : > { %s2194_s22 = smov %s1775_s23  ;;  %s2195_s23 = smov %s1896_s9 }
 0x1fd   : > { %s2196_s24 = smov %s1887_s29  ;;  %23 = sbr.rel (!%p21_p3) target bundleno = 7 (0x7), region = 102 }
 0x202   :  { %1140 = vsyncpa [#allocation3], 1 }
 0x203   :  { %1142 = vsyncpa [#allocation3 + $0x1], 1 }
 0x204   :  { %1143 = vsyncpa [#allocation7], 1 }
 0x205   :  { %1144 = vsyncpa [#allocation4], 1 }
 0x206   :  { %1146 = vsyncpa [#allocation4 + $0x1], 1 }
 0x207   :  { %1147 = vsyncpa [#allocation5], 1 }
 0x208   :  { %1149 = vsyncpa [#allocation5 + $0x1], 1 }

</bundles_post_ra>
